<compile_context>
chip_gen: v7x
topology: tpu7x:2x2x1
jax: 0.10.0
libtpu: 0.0.40
codegen_flags: <defaults>
</compile_context>

<pallas_src>
import math

import jax
import jax.numpy as jnp
from jax.experimental import pallas as pl
from jax.experimental.pallas import tpu as pltpu

# --- scaled-down DistilBERT config -------------------------------------------------
VOCAB = 100
MAX_POS = 32
HIDDEN = 128            # stand-in for 768
N_HEADS = 2
HEAD_DIM = HIDDEN // N_HEADS
HEAD_PAD = 128          # per-head lane padding: every head slice is a full vreg lane tile
FFN = 256               # stand-in for 3072
N_LAYERS = 2            # stand-in for 6
N_CLASSES = 6
PAD_CLASSES = 128       # lane-dense padded classifier width (slice [:, :6] outside)
POOL_ROWS = 8           # sublane-dense pooled/output rows (slice [:BATCH] outside)
LN_EPS = 1e-12
BATCH = 2
SEQ = 8
BS = BATCH * SEQ

# TODO(synk): pretrained 'distilbert-base-uncased' weights / tokenizer cannot be
# loaded here; parameters are synthesized deterministically below.


def _layer_norm(x, g, b):
    mu = jnp.mean(x, axis=-1, keepdims=True)
    var = jnp.mean((x - mu) ** 2, axis=-1, keepdims=True)
    return (x - mu) * jax.lax.rsqrt(var + LN_EPS) * g + b


def _gelu(x):
    # TODO(synk): tanh-approximate GELU (tanh -> EUP); HF DistilBERT uses erf GELU.
    return 0.5 * x * (1.0 + jnp.tanh(0.7978845608028654 * (x + 0.044715 * x * x * x)))


def _mm(a, w):
    # MXU matmul: bf16 operands, f32 accumulation
    return jnp.dot(a.astype(jnp.bfloat16), w.astype(jnp.bfloat16),
                   preferred_element_type=jnp.float32)


# --------------------------- fused whole-forward kernel ---------------------------
def _fused_forward_kernel(xemb_ref, bias_ref, embg_ref, embb_ref,
                          wqkv_ref, bqkv_ref, wo_ref, w1_ref, b1_ref,
                          w2_ref, vech_ref,
                          prew_ref, preb_ref, clsw_ref, clsb_ref,
                          out_ref):
    f32 = jnp.float32

    # embedding LayerNorm
    x = _layer_norm(xemb_ref[...], embg_ref[...], embb_ref[...])        # (BS, H) f32

    # layer-invariant additive attention bias, precomputed in the wrapper
    bias = bias_ref[...]                                                # (BS, BS) f32

    scale = 1.0 / math.sqrt(HEAD_DIM)
    dn = (((1,), (1,)), ((), ()))            # contract last dims of q,k (no transpose)
    KOFF = N_HEADS * HEAD_PAD
    VOFF = 2 * N_HEADS * HEAD_PAD

    # statically unrolled layer loop; all stacked weights resident in VMEM
    for l in range(N_LAYERS):
        vecs = vech_ref[l]                                              # (8, H) f32
        bo, ln1g, ln1b = vecs[0:1, :], vecs[1:2, :], vecs[2:3, :]
        b2, ln2g, ln2b = vecs[3:4, :], vecs[4:5, :], vecs[5:6, :]

        # fused head-padded QKV projection: (BS, 3 * N_HEADS * HEAD_PAD)
        qkv = _mm(x, wqkv_ref[l]) + bqkv_ref[l]

        wo_l = wo_ref[l]                                                # (NH*HP, H) bf16
        attn = jnp.zeros((BS, HIDDEN), f32)
        for h in range(N_HEADS):
            qo = h * HEAD_PAD
            qh = (qkv[:, qo:qo + HEAD_PAD] * scale).astype(jnp.bfloat16)
            kh = qkv[:, KOFF + qo:KOFF + qo + HEAD_PAD].astype(jnp.bfloat16)
            vh = qkv[:, VOFF + qo:VOFF + qo + HEAD_PAD].astype(jnp.bfloat16)
            # 128-deep (zero-padded) score contraction, lane-aligned slices
            s = jax.lax.dot_general(qh, kh, dn, preferred_element_type=f32) + bias
            s = s - jnp.max(s, axis=-1, keepdims=True)
            e = jnp.exp(s)
            p = e * pl.reciprocal(jnp.sum(e, axis=-1, keepdims=True), approx=True)
            ctx_h = jnp.dot(p.astype(jnp.bfloat16), vh,
                            preferred_element_type=f32)                 # (BS, HP)
            # fold the output projection into per-head accumulation (no concat)
            attn = attn + _mm(ctx_h, wo_l[qo:qo + HEAD_PAD, :])

        attn = attn + bo
        h1 = _layer_norm(x + attn, ln1g, ln1b)                          # sa_layer_norm
        ff = _gelu(_mm(h1, w1_ref[l]) + b1_ref[l])
        ff = _mm(ff, w2_ref[l]) + b2
        x = _layer_norm(h1 + ff, ln2g, ln2b)                            # output_layer_norm

    # CLS pool via constant one-hot selection matmul -> 8-row sublane/lane-dense slab
    r = jax.lax.broadcasted_iota(jnp.int32, (POOL_ROWS, BS), 0)
    c = jax.lax.broadcasted_iota(jnp.int32, (POOL_ROWS, BS), 1)
    sel = jnp.where((c == r * SEQ) & (r < BATCH), 1.0, 0.0).astype(jnp.bfloat16)
    pooled = jnp.dot(sel, x.astype(jnp.bfloat16),
                     preferred_element_type=f32)                        # (8, H)

    # pre_classifier -> tanh -> (dropout=identity in eval) -> classifier
    ph = jnp.tanh(_mm(pooled, prew_ref[...]) + preb_ref[...])
    out_ref[...] = _mm(ph, clsw_ref[...]) + clsb_ref[...]               # (8, 128) full tile


def fused_forward(x_emb, attn_bias, p):
    n_in = 15
    vmem = lambda: pl.BlockSpec(memory_space=pltpu.MemorySpace.VMEM)
    return pl.pallas_call(
        _fused_forward_kernel,
        out_shape=jax.ShapeDtypeStruct((POOL_ROWS, PAD_CLASSES), jnp.float32),
        in_specs=[vmem() for _ in range(n_in)],
        out_specs=vmem(),
    )(x_emb, attn_bias, p["emb_ln_g"], p["emb_ln_b"],
      p["wqkv"], p["bqkv"], p["wo"], p["w1"], p["b1"], p["w2"], p["vec_h"],
      p["pre_w"], p["pre_b"], p["cls_w"], p["cls_b"])


# --------------------------- parameters & full forward ----------------------------
def init_params(key):
    def init(k, shape):
        return jax.random.normal(k, shape, jnp.float32) * 0.02

    k = jax.random.split(key, 10)

    # raw attention weights, then laid out head-padded (HEAD_PAD lanes per head)
    wq = init(k[2], (N_LAYERS, HIDDEN, HIDDEN))
    wk = init(k[3], (N_LAYERS, HIDDEN, HIDDEN))
    wv = init(k[4], (N_LAYERS, HIDDEN, HIDDEN))
    wo = init(k[5], (N_LAYERS, HIDDEN, HIDDEN))

    def pad_head_cols(w):   # (L, H, H) -> (L, H, NH*HP); head-h cols at [h*HP : h*HP+HD]
        w_h = w.reshape(N_LAYERS, HIDDEN, N_HEADS, HEAD_DIM)
        out = jnp.zeros((N_LAYERS, HIDDEN, N_HEADS, HEAD_PAD), jnp.float32)
        out = out.at[..., :HEAD_DIM].set(w_h)
        return out.reshape(N_LAYERS, HIDDEN, N_HEADS * HEAD_PAD)

    wqkv = jnp.concatenate([pad_head_cols(wq), pad_head_cols(wk), pad_head_cols(wv)],
                           axis=-1)                                     # (L, H, 3*NH*HP)
    # padded head columns of the QKV bias must remain zero (scores/values unchanged)
    bqkv = jnp.zeros((N_LAYERS, 1, 3 * N_HEADS * HEAD_PAD), jnp.float32)

    wo_h = wo.reshape(N_LAYERS, N_HEADS, HEAD_DIM, HIDDEN)
    wo_pad = jnp.zeros((N_LAYERS, N_HEADS, HEAD_PAD, HIDDEN), jnp.float32)
    wo_pad = wo_pad.at[:, :, :HEAD_DIM, :].set(wo_h)
    wo_pad = wo_pad.reshape(N_LAYERS, N_HEADS * HEAD_PAD, HIDDEN)       # (L, NH*HP, H)

    # per-layer vectors stacked into an 8-row (sublane-aligned) slab:
    # [attn-out bias, sa_ln gamma, sa_ln beta, ffn lin2 bias, out_ln gamma, out_ln beta, 0, 0]
    vec_h_one = jnp.stack([
        jnp.zeros((HIDDEN,), jnp.float32),
        jnp.ones((HIDDEN,), jnp.float32),
        jnp.zeros((HIDDEN,), jnp.float32),
        jnp.zeros((HIDDEN,), jnp.float32),
        jnp.ones((HIDDEN,), jnp.float32),
        jnp.zeros((HIDDEN,), jnp.float32),
        jnp.zeros((HIDDEN,), jnp.float32),
        jnp.zeros((HIDDEN,), jnp.float32),
    ], axis=0)

    cls_w_raw = init(k[7], (HIDDEN, N_CLASSES))
    cls_w = jnp.zeros((HIDDEN, PAD_CLASSES), jnp.float32).at[:, :N_CLASSES].set(cls_w_raw)

    return {
        "word_emb": init(k[0], (VOCAB, HIDDEN)),
        "pos_emb": init(k[1], (MAX_POS, HIDDEN)),
        "emb_ln_g": jnp.ones((1, HIDDEN), jnp.float32),
        "emb_ln_b": jnp.zeros((1, HIDDEN), jnp.float32),
        # stacked per-layer weights; MXU operands stored bf16 (f32 accumulation)
        "wqkv": wqkv.astype(jnp.bfloat16),
        "bqkv": bqkv,
        "wo": wo_pad.astype(jnp.bfloat16),
        "w1": init(k[8], (N_LAYERS, HIDDEN, FFN)).astype(jnp.bfloat16),
        "b1": jnp.zeros((N_LAYERS, 1, FFN), jnp.float32),
        "w2": init(k[9], (N_LAYERS, FFN, HIDDEN)).astype(jnp.bfloat16),
        "vec_h": jnp.tile(vec_h_one[None], (N_LAYERS, 1, 1)),
        "pre_w": init(k[6], (HIDDEN, HIDDEN)).astype(jnp.bfloat16),
        "pre_b": jnp.zeros((1, HIDDEN), jnp.float32),
        "cls_w": cls_w.astype(jnp.bfloat16),
        "cls_b": jnp.zeros((1, PAD_CLASSES), jnp.float32),
    }


def _build_attn_bias(attention_mask):
    # (B, S) -> (BS, BS) additive bias: 0 where same-batch AND key valid, -1e9 otherwise.
    key_valid = attention_mask.astype(jnp.float32).reshape(BS)
    row_b = jnp.arange(BS, dtype=jnp.int32) // SEQ
    ok = (row_b[:, None] == row_b[None, :]) & (key_valid[None, :] > 0.5)
    return jnp.where(ok, 0.0, -1e9).astype(jnp.float32)


def distilbert_class_forward(params, input_ids, attention_mask, token_type_ids):
    del token_type_ids  # DistilBERT ignores token_type_ids (as in the PyTorch module)
    B, S = input_ids.shape
    # embedding gather + layer-invariant attention bias are glue, done in plain JAX
    word = jnp.take(params["word_emb"], input_ids, axis=0)              # (B, S, H)
    pos = params["pos_emb"][:S][None, :, :]                             # (1, S, H)
    x_emb = (word + pos).reshape(B * S, HIDDEN)                         # (B*S, H)
    attn_bias = _build_attn_bias(attention_mask)                        # (BS, BS)
    logits_padded = fused_forward(x_emb, attn_bias, params)             # (8, 128)
    return logits_padded[:B, :N_CLASSES]                                # (B, 6)


if __name__ == "__main__":
    key = jax.random.PRNGKey(0)
    pkey, ikey = jax.random.split(key)
    params = init_params(pkey)

    input_ids = jax.random.randint(ikey, (BATCH, SEQ), 0, VOCAB, dtype=jnp.int32)
    attention_mask = jnp.ones((BATCH, SEQ), jnp.int32).at[1, SEQ - 2:].set(0)
    token_type_ids = jnp.zeros((BATCH, SEQ), jnp.int32)

    logits = jax.jit(distilbert_class_forward)(params, input_ids, attention_mask,
                                               token_type_ids)
    logits = jax.block_until_ready(logits)
    assert logits.shape == (BATCH, N_CLASSES) and logits.dtype == jnp.float32
    assert bool(jnp.all(jnp.isfinite(logits)))
    print("KERNEL_OK")
</pallas_src>

<mosaic_0001>
module attributes {stable_mosaic.version = 11 : i64} {
  func.func @_fused_forward_kernel(%arg0: memref<16x128xf32, #tpu.memory_space<vmem>>, %arg1: memref<16x16xf32, #tpu.memory_space<vmem>>, %arg2: memref<1x128xf32, #tpu.memory_space<vmem>>, %arg3: memref<1x128xf32, #tpu.memory_space<vmem>>, %arg4: memref<2x128x768xbf16, #tpu.memory_space<vmem>>, %arg5: memref<2x1x768xf32, #tpu.memory_space<vmem>>, %arg6: memref<2x256x128xbf16, #tpu.memory_space<vmem>>, %arg7: memref<2x128x256xbf16, #tpu.memory_space<vmem>>, %arg8: memref<2x1x256xf32, #tpu.memory_space<vmem>>, %arg9: memref<2x256x128xbf16, #tpu.memory_space<vmem>>, %arg10: memref<2x8x128xf32, #tpu.memory_space<vmem>>, %arg11: memref<128x128xbf16, #tpu.memory_space<vmem>>, %arg12: memref<1x128xf32, #tpu.memory_space<vmem>>, %arg13: memref<128x128xbf16, #tpu.memory_space<vmem>>, %arg14: memref<1x128xf32, #tpu.memory_space<vmem>>, %arg15: memref<8x128xf32, #tpu.memory_space<vmem>>) attributes {dimension_semantics = [], scalar_prefetch = 0 : i64, scratch_operands = 0 : i64, tpu.core_type = #tpu.core_type<tc>} {
    %c0 = arith.constant 0 : index
    %c0_0 = arith.constant 0 : index
    %0 = vector.load %arg0[%c0, %c0_0] : memref<16x128xf32, #tpu.memory_space<vmem>>, vector<16x128xf32>
    %c0_1 = arith.constant 0 : index
    %c0_2 = arith.constant 0 : index
    %1 = vector.load %arg2[%c0_1, %c0_2] : memref<1x128xf32, #tpu.memory_space<vmem>>, vector<1x128xf32>
    %c0_3 = arith.constant 0 : index
    %c0_4 = arith.constant 0 : index
    %2 = vector.load %arg3[%c0_3, %c0_4] : memref<1x128xf32, #tpu.memory_space<vmem>>, vector<1x128xf32>
    %cst = arith.constant dense<0.000000e+00> : vector<16xf32>
    %3 = vector.multi_reduction <add>, %0, %cst [1] : vector<16x128xf32> to vector<16xf32>
    %4 = vector.shape_cast %3 : vector<16xf32> to vector<16x1xf32>
    %cst_5 = arith.constant 1.280000e+02 : f32
    %5 = vector.broadcast %cst_5 : f32 to vector<16x1xf32>
    %6 = arith.divf %4, %5 : vector<16x1xf32>
    %7 = vector.broadcast %6 : vector<16x1xf32> to vector<16x128xf32>
    %8 = arith.subf %0, %7 : vector<16x128xf32>
    %9 = arith.mulf %8, %8 : vector<16x128xf32>
    %cst_6 = arith.constant dense<0.000000e+00> : vector<16xf32>
    %10 = vector.multi_reduction <add>, %9, %cst_6 [1] : vector<16x128xf32> to vector<16xf32>
    %11 = vector.shape_cast %10 : vector<16xf32> to vector<16x1xf32>
    %cst_7 = arith.constant 1.280000e+02 : f32
    %12 = vector.broadcast %cst_7 : f32 to vector<16x1xf32>
    %13 = arith.divf %11, %12 : vector<16x1xf32>
    %14 = vector.broadcast %6 : vector<16x1xf32> to vector<16x128xf32>
    %15 = arith.subf %0, %14 : vector<16x128xf32>
    %cst_8 = arith.constant 9.99999996E-13 : f32
    %16 = vector.broadcast %cst_8 : f32 to vector<16x1xf32>
    %17 = arith.addf %13, %16 : vector<16x1xf32>
    %18 = math.rsqrt %17 : vector<16x1xf32>
    %19 = vector.broadcast %18 : vector<16x1xf32> to vector<16x128xf32>
    %20 = arith.mulf %15, %19 : vector<16x128xf32>
    %21 = vector.broadcast %1 : vector<1x128xf32> to vector<16x128xf32>
    %22 = arith.mulf %20, %21 : vector<16x128xf32>
    %23 = vector.broadcast %2 : vector<1x128xf32> to vector<16x128xf32>
    %24 = arith.addf %22, %23 : vector<16x128xf32>
    %c0_9 = arith.constant 0 : index
    %c0_10 = arith.constant 0 : index
    %25 = vector.load %arg1[%c0_9, %c0_10] : memref<16x16xf32, #tpu.memory_space<vmem>>, vector<16x16xf32>
    %c0_11 = arith.constant 0 : index
    %c0_12 = arith.constant 0 : index
    %c0_13 = arith.constant 0 : index
    %26 = vector.load %arg10[%c0_11, %c0_12, %c0_13] : memref<2x8x128xf32, #tpu.memory_space<vmem>>, vector<1x8x128xf32>
    %27 = vector.shape_cast %26 : vector<1x8x128xf32> to vector<8x128xf32>
    %28 = vector.extract_strided_slice %27 {offsets = [0, 0], sizes = [1, 128], strides = [1, 1]} : vector<8x128xf32> to vector<1x128xf32>
    %29 = vector.extract_strided_slice %27 {offsets = [1, 0], sizes = [1, 128], strides = [1, 1]} : vector<8x128xf32> to vector<1x128xf32>
    %30 = vector.extract_strided_slice %27 {offsets = [2, 0], sizes = [1, 128], strides = [1, 1]} : vector<8x128xf32> to vector<1x128xf32>
    %31 = vector.extract_strided_slice %27 {offsets = [3, 0], sizes = [1, 128], strides = [1, 1]} : vector<8x128xf32> to vector<1x128xf32>
    %32 = vector.extract_strided_slice %27 {offsets = [4, 0], sizes = [1, 128], strides = [1, 1]} : vector<8x128xf32> to vector<1x128xf32>
    %33 = vector.extract_strided_slice %27 {offsets = [5, 0], sizes = [1, 128], strides = [1, 1]} : vector<8x128xf32> to vector<1x128xf32>
    %c0_14 = arith.constant 0 : index
    %c0_15 = arith.constant 0 : index
    %c0_16 = arith.constant 0 : index
    %34 = vector.load %arg4[%c0_14, %c0_15, %c0_16] : memref<2x128x768xbf16, #tpu.memory_space<vmem>>, vector<1x128x768xbf16>
    %35 = vector.shape_cast %34 : vector<1x128x768xbf16> to vector<128x768xbf16>
    %36 = arith.truncf %24 : vector<16x128xf32> to vector<16x128xbf16>
    %cst_17 = arith.constant dense<0.000000e+00> : vector<16x768xf32>
    %37 = tpu.matmul %36, %35, %cst_17 {dimension_numbers = #tpu.dot_dimension_numbers<[1], [0], [0], [1], [0, 0, 1, 1], [], []>} : vector<16x128xbf16>, vector<128x768xbf16>, vector<16x768xf32> -> vector<16x768xf32>
    %c0_18 = arith.constant 0 : index
    %c0_19 = arith.constant 0 : index
    %c0_20 = arith.constant 0 : index
    %38 = vector.load %arg5[%c0_18, %c0_19, %c0_20] : memref<2x1x768xf32, #tpu.memory_space<vmem>>, vector<1x1x768xf32>
    %39 = vector.shape_cast %38 : vector<1x1x768xf32> to vector<1x768xf32>
    %40 = vector.broadcast %39 : vector<1x768xf32> to vector<16x768xf32>
    %41 = arith.addf %37, %40 : vector<16x768xf32>
    %c0_21 = arith.constant 0 : index
    %c0_22 = arith.constant 0 : index
    %c0_23 = arith.constant 0 : index
    %42 = vector.load %arg6[%c0_21, %c0_22, %c0_23] : memref<2x256x128xbf16, #tpu.memory_space<vmem>>, vector<1x256x128xbf16>
    %43 = vector.shape_cast %42 : vector<1x256x128xbf16> to vector<256x128xbf16>
    %cst_24 = arith.constant 0.000000e+00 : f32
    %44 = vector.broadcast %cst_24 : f32 to vector<16x128xf32>
    %45 = vector.extract_strided_slice %41 {offsets = [0, 0], sizes = [16, 128], strides = [1, 1]} : vector<16x768xf32> to vector<16x128xf32>
    %cst_25 = arith.constant 1.250000e-01 : f32
    %46 = vector.broadcast %cst_25 : f32 to vector<16x128xf32>
    %47 = arith.mulf %45, %46 : vector<16x128xf32>
    %48 = arith.truncf %47 : vector<16x128xf32> to vector<16x128xbf16>
    %49 = vector.extract_strided_slice %41 {offsets = [0, 256], sizes = [16, 128], strides = [1, 1]} : vector<16x768xf32> to vector<16x128xf32>
    %50 = arith.truncf %49 : vector<16x128xf32> to vector<16x128xbf16>
    %51 = vector.extract_strided_slice %41 {offsets = [0, 512], sizes = [16, 128], strides = [1, 1]} : vector<16x768xf32> to vector<16x128xf32>
    %52 = arith.truncf %51 : vector<16x128xf32> to vector<16x128xbf16>
    %cst_26 = arith.constant dense<0.000000e+00> : vector<16x16xf32>
    %53 = tpu.matmul %48, %50, %cst_26 {dimension_numbers = #tpu.dot_dimension_numbers<[1], [1], [0], [0], [0, 0, 1, 0], [], []>} : vector<16x128xbf16>, vector<16x128xbf16>, vector<16x16xf32> -> vector<16x16xf32>
    %54 = arith.addf %53, %25 : vector<16x16xf32>
    %cst_27 = arith.constant dense<0xFF800000> : vector<16xf32>
    %55 = vector.multi_reduction <maximumf>, %54, %cst_27 [1] : vector<16x16xf32> to vector<16xf32>
    %56 = vector.shape_cast %55 : vector<16xf32> to vector<16x1xf32>
    %57 = vector.broadcast %56 : vector<16x1xf32> to vector<16x16xf32>
    %58 = arith.subf %54, %57 : vector<16x16xf32>
    %59 = math.exp %58 : vector<16x16xf32>
    %cst_28 = arith.constant dense<0.000000e+00> : vector<16xf32>
    %60 = vector.multi_reduction <add>, %59, %cst_28 [1] : vector<16x16xf32> to vector<16xf32>
    %61 = vector.shape_cast %60 : vector<16xf32> to vector<16x1xf32>
    %62 = tpu.reciprocal %61 {approx = true} : vector<16x1xf32> -> vector<16x1xf32>
    %63 = vector.broadcast %62 : vector<16x1xf32> to vector<16x16xf32>
    %64 = arith.mulf %59, %63 : vector<16x16xf32>
    %65 = arith.truncf %64 : vector<16x16xf32> to vector<16x16xbf16>
    %cst_29 = arith.constant dense<0.000000e+00> : vector<16x128xf32>
    %66 = tpu.matmul %65, %52, %cst_29 {dimension_numbers = #tpu.dot_dimension_numbers<[1], [0], [0], [1], [0, 0, 1, 1], [], []>} : vector<16x16xbf16>, vector<16x128xbf16>, vector<16x128xf32> -> vector<16x128xf32>
    %67 = vector.extract_strided_slice %43 {offsets = [0, 0], sizes = [128, 128], strides = [1, 1]} : vector<256x128xbf16> to vector<128x128xbf16>
    %68 = arith.truncf %66 : vector<16x128xf32> to vector<16x128xbf16>
    %cst_30 = arith.constant dense<0.000000e+00> : vector<16x128xf32>
    %69 = tpu.matmul %68, %67, %cst_30 {dimension_numbers = #tpu.dot_dimension_numbers<[1], [0], [0], [1], [0, 0, 1, 1], [], []>} : vector<16x128xbf16>, vector<128x128xbf16>, vector<16x128xf32> -> vector<16x128xf32>
    %70 = arith.addf %44, %69 : vector<16x128xf32>
    %71 = vector.extract_strided_slice %41 {offsets = [0, 128], sizes = [16, 128], strides = [1, 1]} : vector<16x768xf32> to vector<16x128xf32>
    %cst_31 = arith.constant 1.250000e-01 : f32
    %72 = vector.broadcast %cst_31 : f32 to vector<16x128xf32>
    %73 = arith.mulf %71, %72 : vector<16x128xf32>
    %74 = arith.truncf %73 : vector<16x128xf32> to vector<16x128xbf16>
    %75 = vector.extract_strided_slice %41 {offsets = [0, 384], sizes = [16, 128], strides = [1, 1]} : vector<16x768xf32> to vector<16x128xf32>
    %76 = arith.truncf %75 : vector<16x128xf32> to vector<16x128xbf16>
    %77 = vector.extract_strided_slice %41 {offsets = [0, 640], sizes = [16, 128], strides = [1, 1]} : vector<16x768xf32> to vector<16x128xf32>
    %78 = arith.truncf %77 : vector<16x128xf32> to vector<16x128xbf16>
    %cst_32 = arith.constant dense<0.000000e+00> : vector<16x16xf32>
    %79 = tpu.matmul %74, %76, %cst_32 {dimension_numbers = #tpu.dot_dimension_numbers<[1], [1], [0], [0], [0, 0, 1, 0], [], []>} : vector<16x128xbf16>, vector<16x128xbf16>, vector<16x16xf32> -> vector<16x16xf32>
    %80 = arith.addf %79, %25 : vector<16x16xf32>
    %cst_33 = arith.constant dense<0xFF800000> : vector<16xf32>
    %81 = vector.multi_reduction <maximumf>, %80, %cst_33 [1] : vector<16x16xf32> to vector<16xf32>
    %82 = vector.shape_cast %81 : vector<16xf32> to vector<16x1xf32>
    %83 = vector.broadcast %82 : vector<16x1xf32> to vector<16x16xf32>
    %84 = arith.subf %80, %83 : vector<16x16xf32>
    %85 = math.exp %84 : vector<16x16xf32>
    %cst_34 = arith.constant dense<0.000000e+00> : vector<16xf32>
    %86 = vector.multi_reduction <add>, %85, %cst_34 [1] : vector<16x16xf32> to vector<16xf32>
    %87 = vector.shape_cast %86 : vector<16xf32> to vector<16x1xf32>
    %88 = tpu.reciprocal %87 {approx = true} : vector<16x1xf32> -> vector<16x1xf32>
    %89 = vector.broadcast %88 : vector<16x1xf32> to vector<16x16xf32>
    %90 = arith.mulf %85, %89 : vector<16x16xf32>
    %91 = arith.truncf %90 : vector<16x16xf32> to vector<16x16xbf16>
    %cst_35 = arith.constant dense<0.000000e+00> : vector<16x128xf32>
    %92 = tpu.matmul %91, %78, %cst_35 {dimension_numbers = #tpu.dot_dimension_numbers<[1], [0], [0], [1], [0, 0, 1, 1], [], []>} : vector<16x16xbf16>, vector<16x128xbf16>, vector<16x128xf32> -> vector<16x128xf32>
    %93 = vector.extract_strided_slice %43 {offsets = [128, 0], sizes = [128, 128], strides = [1, 1]} : vector<256x128xbf16> to vector<128x128xbf16>
    %94 = arith.truncf %92 : vector<16x128xf32> to vector<16x128xbf16>
    %cst_36 = arith.constant dense<0.000000e+00> : vector<16x128xf32>
    %95 = tpu.matmul %94, %93, %cst_36 {dimension_numbers = #tpu.dot_dimension_numbers<[1], [0], [0], [1], [0, 0, 1, 1], [], []>} : vector<16x128xbf16>, vector<128x128xbf16>, vector<16x128xf32> -> vector<16x128xf32>
    %96 = arith.addf %70, %95 : vector<16x128xf32>
    %97 = vector.broadcast %28 : vector<1x128xf32> to vector<16x128xf32>
    %98 = arith.addf %96, %97 : vector<16x128xf32>
    %99 = arith.addf %24, %98 : vector<16x128xf32>
    %cst_37 = arith.constant dense<0.000000e+00> : vector<16xf32>
    %100 = vector.multi_reduction <add>, %99, %cst_37 [1] : vector<16x128xf32> to vector<16xf32>
    %101 = vector.shape_cast %100 : vector<16xf32> to vector<16x1xf32>
    %cst_38 = arith.constant 1.280000e+02 : f32
    %102 = vector.broadcast %cst_38 : f32 to vector<16x1xf32>
    %103 = arith.divf %101, %102 : vector<16x1xf32>
    %104 = vector.broadcast %103 : vector<16x1xf32> to vector<16x128xf32>
    %105 = arith.subf %99, %104 : vector<16x128xf32>
    %106 = arith.mulf %105, %105 : vector<16x128xf32>
    %cst_39 = arith.constant dense<0.000000e+00> : vector<16xf32>
    %107 = vector.multi_reduction <add>, %106, %cst_39 [1] : vector<16x128xf32> to vector<16xf32>
    %108 = vector.shape_cast %107 : vector<16xf32> to vector<16x1xf32>
    %cst_40 = arith.constant 1.280000e+02 : f32
    %109 = vector.broadcast %cst_40 : f32 to vector<16x1xf32>
    %110 = arith.divf %108, %109 : vector<16x1xf32>
    %111 = vector.broadcast %103 : vector<16x1xf32> to vector<16x128xf32>
    %112 = arith.subf %99, %111 : vector<16x128xf32>
    %cst_41 = arith.constant 9.99999996E-13 : f32
    %113 = vector.broadcast %cst_41 : f32 to vector<16x1xf32>
    %114 = arith.addf %110, %113 : vector<16x1xf32>
    %115 = math.rsqrt %114 : vector<16x1xf32>
    %116 = vector.broadcast %115 : vector<16x1xf32> to vector<16x128xf32>
    %117 = arith.mulf %112, %116 : vector<16x128xf32>
    %118 = vector.broadcast %29 : vector<1x128xf32> to vector<16x128xf32>
    %119 = arith.mulf %117, %118 : vector<16x128xf32>
    %120 = vector.broadcast %30 : vector<1x128xf32> to vector<16x128xf32>
    %121 = arith.addf %119, %120 : vector<16x128xf32>
    %c0_42 = arith.constant 0 : index
    %c0_43 = arith.constant 0 : index
    %c0_44 = arith.constant 0 : index
    %122 = vector.load %arg7[%c0_42, %c0_43, %c0_44] : memref<2x128x256xbf16, #tpu.memory_space<vmem>>, vector<1x128x256xbf16>
    %123 = vector.shape_cast %122 : vector<1x128x256xbf16> to vector<128x256xbf16>
    %124 = arith.truncf %121 : vector<16x128xf32> to vector<16x128xbf16>
    %cst_45 = arith.constant dense<0.000000e+00> : vector<16x256xf32>
    %125 = tpu.matmul %124, %123, %cst_45 {dimension_numbers = #tpu.dot_dimension_numbers<[1], [0], [0], [1], [0, 0, 1, 1], [], []>} : vector<16x128xbf16>, vector<128x256xbf16>, vector<16x256xf32> -> vector<16x256xf32>
    %c0_46 = arith.constant 0 : index
    %c0_47 = arith.constant 0 : index
    %c0_48 = arith.constant 0 : index
    %126 = vector.load %arg8[%c0_46, %c0_47, %c0_48] : memref<2x1x256xf32, #tpu.memory_space<vmem>>, vector<1x1x256xf32>
    %127 = vector.shape_cast %126 : vector<1x1x256xf32> to vector<1x256xf32>
    %128 = vector.broadcast %127 : vector<1x256xf32> to vector<16x256xf32>
    %129 = arith.addf %125, %128 : vector<16x256xf32>
    %cst_49 = arith.constant 5.000000e-01 : f32
    %130 = vector.broadcast %cst_49 : f32 to vector<16x256xf32>
    %131 = arith.mulf %130, %129 : vector<16x256xf32>
    %cst_50 = arith.constant 4.471500e-02 : f32
    %132 = vector.broadcast %cst_50 : f32 to vector<16x256xf32>
    %133 = arith.mulf %132, %129 : vector<16x256xf32>
    %134 = arith.mulf %133, %129 : vector<16x256xf32>
    %135 = arith.mulf %134, %129 : vector<16x256xf32>
    %136 = arith.addf %129, %135 : vector<16x256xf32>
    %cst_51 = arith.constant 0.797884583 : f32
    %137 = vector.broadcast %cst_51 : f32 to vector<16x256xf32>
    %138 = arith.mulf %137, %136 : vector<16x256xf32>
    %139 = math.tanh %138 : vector<16x256xf32>
    %cst_52 = arith.constant 1.000000e+00 : f32
    %140 = vector.broadcast %cst_52 : f32 to vector<16x256xf32>
    %141 = arith.addf %140, %139 : vector<16x256xf32>
    %142 = arith.mulf %131, %141 : vector<16x256xf32>
    %c0_53 = arith.constant 0 : index
    %c0_54 = arith.constant 0 : index
    %c0_55 = arith.constant 0 : index
    %143 = vector.load %arg9[%c0_53, %c0_54, %c0_55] : memref<2x256x128xbf16, #tpu.memory_space<vmem>>, vector<1x256x128xbf16>
    %144 = vector.shape_cast %143 : vector<1x256x128xbf16> to vector<256x128xbf16>
    %145 = arith.truncf %142 : vector<16x256xf32> to vector<16x256xbf16>
    %cst_56 = arith.constant dense<0.000000e+00> : vector<16x128xf32>
    %146 = tpu.matmul %145, %144, %cst_56 {dimension_numbers = #tpu.dot_dimension_numbers<[1], [0], [0], [1], [0, 0, 1, 1], [], []>} : vector<16x256xbf16>, vector<256x128xbf16>, vector<16x128xf32> -> vector<16x128xf32>
    %147 = vector.broadcast %31 : vector<1x128xf32> to vector<16x128xf32>
    %148 = arith.addf %146, %147 : vector<16x128xf32>
    %149 = arith.addf %121, %148 : vector<16x128xf32>
    %cst_57 = arith.constant dense<0.000000e+00> : vector<16xf32>
    %150 = vector.multi_reduction <add>, %149, %cst_57 [1] : vector<16x128xf32> to vector<16xf32>
    %151 = vector.shape_cast %150 : vector<16xf32> to vector<16x1xf32>
    %cst_58 = arith.constant 1.280000e+02 : f32
    %152 = vector.broadcast %cst_58 : f32 to vector<16x1xf32>
    %153 = arith.divf %151, %152 : vector<16x1xf32>
    %154 = vector.broadcast %153 : vector<16x1xf32> to vector<16x128xf32>
    %155 = arith.subf %149, %154 : vector<16x128xf32>
    %156 = arith.mulf %155, %155 : vector<16x128xf32>
    %cst_59 = arith.constant dense<0.000000e+00> : vector<16xf32>
    %157 = vector.multi_reduction <add>, %156, %cst_59 [1] : vector<16x128xf32> to vector<16xf32>
    %158 = vector.shape_cast %157 : vector<16xf32> to vector<16x1xf32>
    %cst_60 = arith.constant 1.280000e+02 : f32
    %159 = vector.broadcast %cst_60 : f32 to vector<16x1xf32>
    %160 = arith.divf %158, %159 : vector<16x1xf32>
    %161 = vector.broadcast %153 : vector<16x1xf32> to vector<16x128xf32>
    %162 = arith.subf %149, %161 : vector<16x128xf32>
    %cst_61 = arith.constant 9.99999996E-13 : f32
    %163 = vector.broadcast %cst_61 : f32 to vector<16x1xf32>
    %164 = arith.addf %160, %163 : vector<16x1xf32>
    %165 = math.rsqrt %164 : vector<16x1xf32>
    %166 = vector.broadcast %165 : vector<16x1xf32> to vector<16x128xf32>
    %167 = arith.mulf %162, %166 : vector<16x128xf32>
    %168 = vector.broadcast %32 : vector<1x128xf32> to vector<16x128xf32>
    %169 = arith.mulf %167, %168 : vector<16x128xf32>
    %170 = vector.broadcast %33 : vector<1x128xf32> to vector<16x128xf32>
    %171 = arith.addf %169, %170 : vector<16x128xf32>
    %c1 = arith.constant 1 : index
    %c0_62 = arith.constant 0 : index
    %c0_63 = arith.constant 0 : index
    %172 = vector.load %arg10[%c1, %c0_62, %c0_63] : memref<2x8x128xf32, #tpu.memory_space<vmem>>, vector<1x8x128xf32>
    %173 = vector.shape_cast %172 : vector<1x8x128xf32> to vector<8x128xf32>
    %174 = vector.extract_strided_slice %173 {offsets = [0, 0], sizes = [1, 128], strides = [1, 1]} : vector<8x128xf32> to vector<1x128xf32>
    %175 = vector.extract_strided_slice %173 {offsets = [1, 0], sizes = [1, 128], strides = [1, 1]} : vector<8x128xf32> to vector<1x128xf32>
    %176 = vector.extract_strided_slice %173 {offsets = [2, 0], sizes = [1, 128], strides = [1, 1]} : vector<8x128xf32> to vector<1x128xf32>
    %177 = vector.extract_strided_slice %173 {offsets = [3, 0], sizes = [1, 128], strides = [1, 1]} : vector<8x128xf32> to vector<1x128xf32>
    %178 = vector.extract_strided_slice %173 {offsets = [4, 0], sizes = [1, 128], strides = [1, 1]} : vector<8x128xf32> to vector<1x128xf32>
    %179 = vector.extract_strided_slice %173 {offsets = [5, 0], sizes = [1, 128], strides = [1, 1]} : vector<8x128xf32> to vector<1x128xf32>
    %c1_64 = arith.constant 1 : index
    %c0_65 = arith.constant 0 : index
    %c0_66 = arith.constant 0 : index
    %180 = vector.load %arg4[%c1_64, %c0_65, %c0_66] : memref<2x128x768xbf16, #tpu.memory_space<vmem>>, vector<1x128x768xbf16>
    %181 = vector.shape_cast %180 : vector<1x128x768xbf16> to vector<128x768xbf16>
    %182 = arith.truncf %171 : vector<16x128xf32> to vector<16x128xbf16>
    %cst_67 = arith.constant dense<0.000000e+00> : vector<16x768xf32>
    %183 = tpu.matmul %182, %181, %cst_67 {dimension_numbers = #tpu.dot_dimension_numbers<[1], [0], [0], [1], [0, 0, 1, 1], [], []>} : vector<16x128xbf16>, vector<128x768xbf16>, vector<16x768xf32> -> vector<16x768xf32>
    %c1_68 = arith.constant 1 : index
    %c0_69 = arith.constant 0 : index
    %c0_70 = arith.constant 0 : index
    %184 = vector.load %arg5[%c1_68, %c0_69, %c0_70] : memref<2x1x768xf32, #tpu.memory_space<vmem>>, vector<1x1x768xf32>
    %185 = vector.shape_cast %184 : vector<1x1x768xf32> to vector<1x768xf32>
    %186 = vector.broadcast %185 : vector<1x768xf32> to vector<16x768xf32>
    %187 = arith.addf %183, %186 : vector<16x768xf32>
    %c1_71 = arith.constant 1 : index
    %c0_72 = arith.constant 0 : index
    %c0_73 = arith.constant 0 : index
    %188 = vector.load %arg6[%c1_71, %c0_72, %c0_73] : memref<2x256x128xbf16, #tpu.memory_space<vmem>>, vector<1x256x128xbf16>
    %189 = vector.shape_cast %188 : vector<1x256x128xbf16> to vector<256x128xbf16>
    %cst_74 = arith.constant 0.000000e+00 : f32
    %190 = vector.broadcast %cst_74 : f32 to vector<16x128xf32>
    %191 = vector.extract_strided_slice %187 {offsets = [0, 0], sizes = [16, 128], strides = [1, 1]} : vector<16x768xf32> to vector<16x128xf32>
    %cst_75 = arith.constant 1.250000e-01 : f32
    %192 = vector.broadcast %cst_75 : f32 to vector<16x128xf32>
    %193 = arith.mulf %191, %192 : vector<16x128xf32>
    %194 = arith.truncf %193 : vector<16x128xf32> to vector<16x128xbf16>
    %195 = vector.extract_strided_slice %187 {offsets = [0, 256], sizes = [16, 128], strides = [1, 1]} : vector<16x768xf32> to vector<16x128xf32>
    %196 = arith.truncf %195 : vector<16x128xf32> to vector<16x128xbf16>
    %197 = vector.extract_strided_slice %187 {offsets = [0, 512], sizes = [16, 128], strides = [1, 1]} : vector<16x768xf32> to vector<16x128xf32>
    %198 = arith.truncf %197 : vector<16x128xf32> to vector<16x128xbf16>
    %cst_76 = arith.constant dense<0.000000e+00> : vector<16x16xf32>
    %199 = tpu.matmul %194, %196, %cst_76 {dimension_numbers = #tpu.dot_dimension_numbers<[1], [1], [0], [0], [0, 0, 1, 0], [], []>} : vector<16x128xbf16>, vector<16x128xbf16>, vector<16x16xf32> -> vector<16x16xf32>
    %200 = arith.addf %199, %25 : vector<16x16xf32>
    %cst_77 = arith.constant dense<0xFF800000> : vector<16xf32>
    %201 = vector.multi_reduction <maximumf>, %200, %cst_77 [1] : vector<16x16xf32> to vector<16xf32>
    %202 = vector.shape_cast %201 : vector<16xf32> to vector<16x1xf32>
    %203 = vector.broadcast %202 : vector<16x1xf32> to vector<16x16xf32>
    %204 = arith.subf %200, %203 : vector<16x16xf32>
    %205 = math.exp %204 : vector<16x16xf32>
    %cst_78 = arith.constant dense<0.000000e+00> : vector<16xf32>
    %206 = vector.multi_reduction <add>, %205, %cst_78 [1] : vector<16x16xf32> to vector<16xf32>
    %207 = vector.shape_cast %206 : vector<16xf32> to vector<16x1xf32>
    %208 = tpu.reciprocal %207 {approx = true} : vector<16x1xf32> -> vector<16x1xf32>
    %209 = vector.broadcast %208 : vector<16x1xf32> to vector<16x16xf32>
    %210 = arith.mulf %205, %209 : vector<16x16xf32>
    %211 = arith.truncf %210 : vector<16x16xf32> to vector<16x16xbf16>
    %cst_79 = arith.constant dense<0.000000e+00> : vector<16x128xf32>
    %212 = tpu.matmul %211, %198, %cst_79 {dimension_numbers = #tpu.dot_dimension_numbers<[1], [0], [0], [1], [0, 0, 1, 1], [], []>} : vector<16x16xbf16>, vector<16x128xbf16>, vector<16x128xf32> -> vector<16x128xf32>
    %213 = vector.extract_strided_slice %189 {offsets = [0, 0], sizes = [128, 128], strides = [1, 1]} : vector<256x128xbf16> to vector<128x128xbf16>
    %214 = arith.truncf %212 : vector<16x128xf32> to vector<16x128xbf16>
    %cst_80 = arith.constant dense<0.000000e+00> : vector<16x128xf32>
    %215 = tpu.matmul %214, %213, %cst_80 {dimension_numbers = #tpu.dot_dimension_numbers<[1], [0], [0], [1], [0, 0, 1, 1], [], []>} : vector<16x128xbf16>, vector<128x128xbf16>, vector<16x128xf32> -> vector<16x128xf32>
    %216 = arith.addf %190, %215 : vector<16x128xf32>
    %217 = vector.extract_strided_slice %187 {offsets = [0, 128], sizes = [16, 128], strides = [1, 1]} : vector<16x768xf32> to vector<16x128xf32>
    %cst_81 = arith.constant 1.250000e-01 : f32
    %218 = vector.broadcast %cst_81 : f32 to vector<16x128xf32>
    %219 = arith.mulf %217, %218 : vector<16x128xf32>
    %220 = arith.truncf %219 : vector<16x128xf32> to vector<16x128xbf16>
    %221 = vector.extract_strided_slice %187 {offsets = [0, 384], sizes = [16, 128], strides = [1, 1]} : vector<16x768xf32> to vector<16x128xf32>
    %222 = arith.truncf %221 : vector<16x128xf32> to vector<16x128xbf16>
    %223 = vector.extract_strided_slice %187 {offsets = [0, 640], sizes = [16, 128], strides = [1, 1]} : vector<16x768xf32> to vector<16x128xf32>
    %224 = arith.truncf %223 : vector<16x128xf32> to vector<16x128xbf16>
    %cst_82 = arith.constant dense<0.000000e+00> : vector<16x16xf32>
    %225 = tpu.matmul %220, %222, %cst_82 {dimension_numbers = #tpu.dot_dimension_numbers<[1], [1], [0], [0], [0, 0, 1, 0], [], []>} : vector<16x128xbf16>, vector<16x128xbf16>, vector<16x16xf32> -> vector<16x16xf32>
    %226 = arith.addf %225, %25 : vector<16x16xf32>
    %cst_83 = arith.constant dense<0xFF800000> : vector<16xf32>
    %227 = vector.multi_reduction <maximumf>, %226, %cst_83 [1] : vector<16x16xf32> to vector<16xf32>
    %228 = vector.shape_cast %227 : vector<16xf32> to vector<16x1xf32>
    %229 = vector.broadcast %228 : vector<16x1xf32> to vector<16x16xf32>
    %230 = arith.subf %226, %229 : vector<16x16xf32>
    %231 = math.exp %230 : vector<16x16xf32>
    %cst_84 = arith.constant dense<0.000000e+00> : vector<16xf32>
    %232 = vector.multi_reduction <add>, %231, %cst_84 [1] : vector<16x16xf32> to vector<16xf32>
    %233 = vector.shape_cast %232 : vector<16xf32> to vector<16x1xf32>
    %234 = tpu.reciprocal %233 {approx = true} : vector<16x1xf32> -> vector<16x1xf32>
    %235 = vector.broadcast %234 : vector<16x1xf32> to vector<16x16xf32>
    %236 = arith.mulf %231, %235 : vector<16x16xf32>
    %237 = arith.truncf %236 : vector<16x16xf32> to vector<16x16xbf16>
    %cst_85 = arith.constant dense<0.000000e+00> : vector<16x128xf32>
    %238 = tpu.matmul %237, %224, %cst_85 {dimension_numbers = #tpu.dot_dimension_numbers<[1], [0], [0], [1], [0, 0, 1, 1], [], []>} : vector<16x16xbf16>, vector<16x128xbf16>, vector<16x128xf32> -> vector<16x128xf32>
    %239 = vector.extract_strided_slice %189 {offsets = [128, 0], sizes = [128, 128], strides = [1, 1]} : vector<256x128xbf16> to vector<128x128xbf16>
    %240 = arith.truncf %238 : vector<16x128xf32> to vector<16x128xbf16>
    %cst_86 = arith.constant dense<0.000000e+00> : vector<16x128xf32>
    %241 = tpu.matmul %240, %239, %cst_86 {dimension_numbers = #tpu.dot_dimension_numbers<[1], [0], [0], [1], [0, 0, 1, 1], [], []>} : vector<16x128xbf16>, vector<128x128xbf16>, vector<16x128xf32> -> vector<16x128xf32>
    %242 = arith.addf %216, %241 : vector<16x128xf32>
    %243 = vector.broadcast %174 : vector<1x128xf32> to vector<16x128xf32>
    %244 = arith.addf %242, %243 : vector<16x128xf32>
    %245 = arith.addf %171, %244 : vector<16x128xf32>
    %cst_87 = arith.constant dense<0.000000e+00> : vector<16xf32>
    %246 = vector.multi_reduction <add>, %245, %cst_87 [1] : vector<16x128xf32> to vector<16xf32>
    %247 = vector.shape_cast %246 : vector<16xf32> to vector<16x1xf32>
    %cst_88 = arith.constant 1.280000e+02 : f32
    %248 = vector.broadcast %cst_88 : f32 to vector<16x1xf32>
    %249 = arith.divf %247, %248 : vector<16x1xf32>
    %250 = vector.broadcast %249 : vector<16x1xf32> to vector<16x128xf32>
    %251 = arith.subf %245, %250 : vector<16x128xf32>
    %252 = arith.mulf %251, %251 : vector<16x128xf32>
    %cst_89 = arith.constant dense<0.000000e+00> : vector<16xf32>
    %253 = vector.multi_reduction <add>, %252, %cst_89 [1] : vector<16x128xf32> to vector<16xf32>
    %254 = vector.shape_cast %253 : vector<16xf32> to vector<16x1xf32>
    %cst_90 = arith.constant 1.280000e+02 : f32
    %255 = vector.broadcast %cst_90 : f32 to vector<16x1xf32>
    %256 = arith.divf %254, %255 : vector<16x1xf32>
    %257 = vector.broadcast %249 : vector<16x1xf32> to vector<16x128xf32>
    %258 = arith.subf %245, %257 : vector<16x128xf32>
    %cst_91 = arith.constant 9.99999996E-13 : f32
    %259 = vector.broadcast %cst_91 : f32 to vector<16x1xf32>
    %260 = arith.addf %256, %259 : vector<16x1xf32>
    %261 = math.rsqrt %260 : vector<16x1xf32>
    %262 = vector.broadcast %261 : vector<16x1xf32> to vector<16x128xf32>
    %263 = arith.mulf %258, %262 : vector<16x128xf32>
    %264 = vector.broadcast %175 : vector<1x128xf32> to vector<16x128xf32>
    %265 = arith.mulf %263, %264 : vector<16x128xf32>
    %266 = vector.broadcast %176 : vector<1x128xf32> to vector<16x128xf32>
    %267 = arith.addf %265, %266 : vector<16x128xf32>
    %c1_92 = arith.constant 1 : index
    %c0_93 = arith.constant 0 : index
    %c0_94 = arith.constant 0 : index
    %268 = vector.load %arg7[%c1_92, %c0_93, %c0_94] : memref<2x128x256xbf16, #tpu.memory_space<vmem>>, vector<1x128x256xbf16>
    %269 = vector.shape_cast %268 : vector<1x128x256xbf16> to vector<128x256xbf16>
    %270 = arith.truncf %267 : vector<16x128xf32> to vector<16x128xbf16>
    %cst_95 = arith.constant dense<0.000000e+00> : vector<16x256xf32>
    %271 = tpu.matmul %270, %269, %cst_95 {dimension_numbers = #tpu.dot_dimension_numbers<[1], [0], [0], [1], [0, 0, 1, 1], [], []>} : vector<16x128xbf16>, vector<128x256xbf16>, vector<16x256xf32> -> vector<16x256xf32>
    %c1_96 = arith.constant 1 : index
    %c0_97 = arith.constant 0 : index
    %c0_98 = arith.constant 0 : index
    %272 = vector.load %arg8[%c1_96, %c0_97, %c0_98] : memref<2x1x256xf32, #tpu.memory_space<vmem>>, vector<1x1x256xf32>
    %273 = vector.shape_cast %272 : vector<1x1x256xf32> to vector<1x256xf32>
    %274 = vector.broadcast %273 : vector<1x256xf32> to vector<16x256xf32>
    %275 = arith.addf %271, %274 : vector<16x256xf32>
    %cst_99 = arith.constant 5.000000e-01 : f32
    %276 = vector.broadcast %cst_99 : f32 to vector<16x256xf32>
    %277 = arith.mulf %276, %275 : vector<16x256xf32>
    %cst_100 = arith.constant 4.471500e-02 : f32
    %278 = vector.broadcast %cst_100 : f32 to vector<16x256xf32>
    %279 = arith.mulf %278, %275 : vector<16x256xf32>
    %280 = arith.mulf %279, %275 : vector<16x256xf32>
    %281 = arith.mulf %280, %275 : vector<16x256xf32>
    %282 = arith.addf %275, %281 : vector<16x256xf32>
    %cst_101 = arith.constant 0.797884583 : f32
    %283 = vector.broadcast %cst_101 : f32 to vector<16x256xf32>
    %284 = arith.mulf %283, %282 : vector<16x256xf32>
    %285 = math.tanh %284 : vector<16x256xf32>
    %cst_102 = arith.constant 1.000000e+00 : f32
    %286 = vector.broadcast %cst_102 : f32 to vector<16x256xf32>
    %287 = arith.addf %286, %285 : vector<16x256xf32>
    %288 = arith.mulf %277, %287 : vector<16x256xf32>
    %c1_103 = arith.constant 1 : index
    %c0_104 = arith.constant 0 : index
    %c0_105 = arith.constant 0 : index
    %289 = vector.load %arg9[%c1_103, %c0_104, %c0_105] : memref<2x256x128xbf16, #tpu.memory_space<vmem>>, vector<1x256x128xbf16>
    %290 = vector.shape_cast %289 : vector<1x256x128xbf16> to vector<256x128xbf16>
    %291 = arith.truncf %288 : vector<16x256xf32> to vector<16x256xbf16>
    %cst_106 = arith.constant dense<0.000000e+00> : vector<16x128xf32>
    %292 = tpu.matmul %291, %290, %cst_106 {dimension_numbers = #tpu.dot_dimension_numbers<[1], [0], [0], [1], [0, 0, 1, 1], [], []>} : vector<16x256xbf16>, vector<256x128xbf16>, vector<16x128xf32> -> vector<16x128xf32>
    %293 = vector.broadcast %177 : vector<1x128xf32> to vector<16x128xf32>
    %294 = arith.addf %292, %293 : vector<16x128xf32>
    %295 = arith.addf %267, %294 : vector<16x128xf32>
    %cst_107 = arith.constant dense<0.000000e+00> : vector<16xf32>
    %296 = vector.multi_reduction <add>, %295, %cst_107 [1] : vector<16x128xf32> to vector<16xf32>
    %297 = vector.shape_cast %296 : vector<16xf32> to vector<16x1xf32>
    %cst_108 = arith.constant 1.280000e+02 : f32
    %298 = vector.broadcast %cst_108 : f32 to vector<16x1xf32>
    %299 = arith.divf %297, %298 : vector<16x1xf32>
    %300 = vector.broadcast %299 : vector<16x1xf32> to vector<16x128xf32>
    %301 = arith.subf %295, %300 : vector<16x128xf32>
    %302 = arith.mulf %301, %301 : vector<16x128xf32>
    %cst_109 = arith.constant dense<0.000000e+00> : vector<16xf32>
    %303 = vector.multi_reduction <add>, %302, %cst_109 [1] : vector<16x128xf32> to vector<16xf32>
    %304 = vector.shape_cast %303 : vector<16xf32> to vector<16x1xf32>
    %cst_110 = arith.constant 1.280000e+02 : f32
    %305 = vector.broadcast %cst_110 : f32 to vector<16x1xf32>
    %306 = arith.divf %304, %305 : vector<16x1xf32>
    %307 = vector.broadcast %299 : vector<16x1xf32> to vector<16x128xf32>
    %308 = arith.subf %295, %307 : vector<16x128xf32>
    %cst_111 = arith.constant 9.99999996E-13 : f32
    %309 = vector.broadcast %cst_111 : f32 to vector<16x1xf32>
    %310 = arith.addf %306, %309 : vector<16x1xf32>
    %311 = math.rsqrt %310 : vector<16x1xf32>
    %312 = vector.broadcast %311 : vector<16x1xf32> to vector<16x128xf32>
    %313 = arith.mulf %308, %312 : vector<16x128xf32>
    %314 = vector.broadcast %178 : vector<1x128xf32> to vector<16x128xf32>
    %315 = arith.mulf %313, %314 : vector<16x128xf32>
    %316 = vector.broadcast %179 : vector<1x128xf32> to vector<16x128xf32>
    %317 = arith.addf %315, %316 : vector<16x128xf32>
    %318 = tpu.iota {dimensions = array<i32: 0>} : vector<8x16xi32>
    %319 = tpu.iota {dimensions = array<i32: 1>} : vector<8x16xi32>
    %c8_i32 = arith.constant 8 : i32
    %320 = vector.broadcast %c8_i32 : i32 to vector<8x16xi32>
    %321 = arith.muli %318, %320 : vector<8x16xi32>
    %322 = arith.cmpi eq, %319, %321 : vector<8x16xi32>
    %c2_i32 = arith.constant 2 : i32
    %323 = vector.broadcast %c2_i32 : i32 to vector<8x16xi32>
    %324 = arith.cmpi slt, %318, %323 : vector<8x16xi32>
    %325 = arith.andi %322, %324 : vector<8x16xi1>
    %cst_112 = arith.constant 1.000000e+00 : f32
    %cst_113 = arith.constant 0.000000e+00 : f32
    %326 = vector.broadcast %cst_112 : f32 to vector<8x16xf32>
    %327 = vector.broadcast %cst_113 : f32 to vector<8x16xf32>
    %328 = arith.select %325, %326, %327 : vector<8x16xi1>, vector<8x16xf32>
    %329 = arith.truncf %328 : vector<8x16xf32> to vector<8x16xbf16>
    %330 = arith.truncf %317 : vector<16x128xf32> to vector<16x128xbf16>
    %cst_114 = arith.constant dense<0.000000e+00> : vector<8x128xf32>
    %331 = tpu.matmul %329, %330, %cst_114 {dimension_numbers = #tpu.dot_dimension_numbers<[1], [0], [0], [1], [0, 0, 1, 1], [], []>} : vector<8x16xbf16>, vector<16x128xbf16>, vector<8x128xf32> -> vector<8x128xf32>
    %c0_115 = arith.constant 0 : index
    %c0_116 = arith.constant 0 : index
    %332 = vector.load %arg11[%c0_115, %c0_116] : memref<128x128xbf16, #tpu.memory_space<vmem>>, vector<128x128xbf16>
    %333 = arith.truncf %331 : vector<8x128xf32> to vector<8x128xbf16>
    %cst_117 = arith.constant dense<0.000000e+00> : vector<8x128xf32>
    %334 = tpu.matmul %333, %332, %cst_117 {dimension_numbers = #tpu.dot_dimension_numbers<[1], [0], [0], [1], [0, 0, 1, 1], [], []>} : vector<8x128xbf16>, vector<128x128xbf16>, vector<8x128xf32> -> vector<8x128xf32>
    %c0_118 = arith.constant 0 : index
    %c0_119 = arith.constant 0 : index
    %335 = vector.load %arg12[%c0_118, %c0_119] : memref<1x128xf32, #tpu.memory_space<vmem>>, vector<1x128xf32>
    %336 = vector.broadcast %335 : vector<1x128xf32> to vector<8x128xf32>
    %337 = arith.addf %334, %336 : vector<8x128xf32>
    %338 = math.tanh %337 : vector<8x128xf32>
    %c0_120 = arith.constant 0 : index
    %c0_121 = arith.constant 0 : index
    %339 = vector.load %arg13[%c0_120, %c0_121] : memref<128x128xbf16, #tpu.memory_space<vmem>>, vector<128x128xbf16>
    %340 = arith.truncf %338 : vector<8x128xf32> to vector<8x128xbf16>
    %cst_122 = arith.constant dense<0.000000e+00> : vector<8x128xf32>
    %341 = tpu.matmul %340, %339, %cst_122 {dimension_numbers = #tpu.dot_dimension_numbers<[1], [0], [0], [1], [0, 0, 1, 1], [], []>} : vector<8x128xbf16>, vector<128x128xbf16>, vector<8x128xf32> -> vector<8x128xf32>
    %c0_123 = arith.constant 0 : index
    %c0_124 = arith.constant 0 : index
    %342 = vector.load %arg14[%c0_123, %c0_124] : memref<1x128xf32, #tpu.memory_space<vmem>>, vector<1x128xf32>
    %343 = vector.broadcast %342 : vector<1x128xf32> to vector<8x128xf32>
    %344 = arith.addf %341, %343 : vector<8x128xf32>
    %c0_125 = arith.constant 0 : index
    %c0_126 = arith.constant 0 : index
    %345 = vector.load %arg15[%c0_125, %c0_126] : memref<8x128xf32, #tpu.memory_space<vmem>>, vector<8x128xf32>
    tpu.vector_store %arg15[%c0_125, %c0_126], %344 {strides = array<i32>} : memref<8x128xf32, #tpu.memory_space<vmem>>, vector<8x128xf32>,
    return
  }
}

</mosaic_0001>

<bundles_post_ra>
// kernel: distilbert_class_forward.1
= control target key start
LH: loop header
LB: loop body
LE: loop exit
PB: predicated region body
PF: predicated region fallthrough
CT: control target
= control target key end

     0   :  { %s4725_s0 = inlined_call_operand.vmem [shape: f32[16,128], index: 0, kind: input, shape index: {}]   ;;  %s4726_s1 = inlined_call_operand.vmem [shape: f32[16,16], index: 1, kind: input, shape index: {}]   ;;  %s4727_s2 = inlined_call_operand.vmem [shape: f32[1,128], index: 2, kind: input, shape index: {}]   ;;  %s4728_s3 = inlined_call_operand.vmem [shape: f32[1,128], index: 3, kind: input, shape index: {}]   ;;  %s4729_s4 = inlined_call_operand.hbm [shape: bf16[2,128,768], index: 4, kind: input, shape index: {}]   ;;  %s4730_s5 = inlined_call_operand.vmem [shape: f32[2,1,768], index: 5, kind: input, shape index: {}]   ;;  %s4731_s6 = inlined_call_operand.vmem [shape: bf16[2,256,128], index: 6, kind: input, shape index: {}]   ;;  %s4732_s7 = inlined_call_operand.hbm [shape: bf16[2,128,256], index: 7, kind: input, shape index: {}]   ;;  %s4733_s8 = inlined_call_operand.vmem [shape: f32[2,1,256], index: 8, kind: input, shape index: {}]   ;;  %s4734_s9 = inlined_call_operand.hbm [shape: bf16[2,256,128], index: 9, kind: input, shape index: {}]   ;;  %s4735_s10 = inlined_call_operand.vmem [shape: f32[2,8,128], index: 10, kind: input, shape index: {}]   ;;  %s4736_s11 = inlined_call_operand.hbm [shape: bf16[128,128], index: 11, kind: input, shape index: {}]   ;;  %s4737_s12 = inlined_call_operand.vmem [shape: f32[1,128], index: 12, kind: input, shape index: {}]   ;;  %s4738_s13 = inlined_call_operand.hbm [shape: bf16[128,128], index: 13, kind: input, shape index: {}]   ;;  %s4739_s14 = inlined_call_operand.vmem [shape: f32[1,128], index: 14, kind: input, shape index: {}]   ;;  %s4740_s15 = inlined_call_operand.vmem [shape: f32[8,128], index: 15, kind: output, shape index: {}]  }
   0x1   :  { %4741 = sst [smem:[#allocation13_spill]] %s4740_s15 }
   0x2   :  { %20 = vsyncpa [#allocation3], 0 }
   0x3   :  { %21 = vsyncpa [#allocation5], 0 }
   0x4   :  { %22 = vsyncpa [#allocation8], 0  ;;  %s4135_s18 = smov [#allocation4]   ;;  %s4019_s22 = scalar_lea.hbm %s4732_s7, 4096 }
   0x5   :  { %s52_s19 = sshll.u32 %s4135_s18, 4  ;;  %p4020_p0 = scmp.ne.s32.totalorder %s4732_s7, %s4019_s22  ;;  %s53_s19 = int_to_ptr.vmem [resolvable:$true] %s52_s19 }
   0x6   :  { %p4023_p1 = scmp.lt.u32.totalorder %s4019_s22, %s4732_s7 }
   0x8   :  { %p4025_p2 = pnand %p4023_p1, %p4020_p0 }
   0xa   :  { %4028 = shalt.err (!%p4025_p2)
}
   0xb   :  { %s4029_s27 = scalar_lea.vmem %s53_s19, 4096  ;;  %p4034_p4 = scmp.lt.s32.totalorder %s53_s19, %s53_s19 }
   0xc   :  { %p4030_p3 = scmp.ne.s32.totalorder %s53_s19, %s4029_s27  ;;  %p4035_p5 = scmp.lt.s32.totalorder %s4029_s27, %s4029_s27 }
   0xe   :  { %p4036_p6 = por %p4035_p5, %p4034_p4 }
  0x10   :  { %p4037_p7 = pnand %p4036_p6, %p4030_p3 }
  0x12   :  { %4040 = shalt.err (!%p4037_p7)
}
  0x13   :  { %s4136_s28 = smov 128   ;;  %s4137_s29 = smov 8  }
  0x14   :  { %58 = dma.hbm_to_vmem [thread:$0]  %s4732_s7, 4096, %s53_s19, [#allocation5], %s4136_s28, %s4136_s28, %s4137_s29  }
  0x15   :  { %s4138_s17 = smov [#allocation7]   ;;  %s4139_s20 = smov [#allocation2]  }
  0x16   :  { %s80_s18 = sshll.u32 %s4138_s17, 4  ;;  %s36_s21 = sshll.u32 %s4139_s20, 4  ;;  %s81_s18 = int_to_ptr.vmem [resolvable:$true] %s80_s18  ;;  %s37_s21 = int_to_ptr.vmem [resolvable:$true] %s36_s21 }
  0x17   :  { %s4041_s24 = scalar_lea.hbm %s4736_s11, 1024 }
  0x18   :  { %p4042_p8 = scmp.ne.s32.totalorder %s4736_s11, %s4041_s24  ;;  %p4045_p9 = scmp.lt.u32.totalorder %s4041_s24, %s4736_s11 }
  0x1a   :  { %p4047_p10 = pnand %p4045_p9, %p4042_p8 }
  0x1c   :  { %4050 = shalt.err (!%p4047_p10)
}
  0x1d   :  { %s4051_s7 = scalar_lea.vmem %s81_s18, 1024  ;;  %p4056_p12 = scmp.lt.s32.totalorder %s81_s18, %s81_s18 }
  0x1e   :  { %p4052_p11 = scmp.ne.s32.totalorder %s81_s18, %s4051_s7  ;;  %p4057_p13 = scmp.lt.s32.totalorder %s4051_s7, %s4051_s7 }
  0x20   :  { %p4058_p0 = por %p4057_p13, %p4056_p12 }
  0x22   :  { %p4059_p1 = pnand %p4058_p0, %p4052_p11 }
  0x24   :  { %4062 = shalt.err (!%p4059_p1)
}
  0x25   :  { %s4140_s19 = smov 64   ;;  %s4141_s28 = smov 4  }
  0x26   :  { %86 = dma.hbm_to_vmem [thread:$0]  %s4736_s11, 1024, %s81_s18, [#allocation8], %s4140_s19, %s4140_s19, %s4141_s28  }
  0x27   :  { %s4063_s17 = scalar_lea.hbm %s4729_s4, 12288 }
  0x28   :  { %p4064_p2 = scmp.ne.s32.totalorder %s4729_s4, %s4063_s17  ;;  %p4067_p3 = scmp.lt.u32.totalorder %s4063_s17, %s4729_s4 }
  0x2a   :  { %p4069_p4 = pnand %p4067_p3, %p4064_p2 }
  0x2c   :  { %4072 = shalt.err (!%p4069_p4)
}
  0x2d   :  { %s4073_s25 = scalar_lea.vmem %s37_s21, 12288  ;;  %p4078_p6 = scmp.lt.s32.totalorder %s37_s21, %s37_s21 }
  0x2e   :  { %p4074_p5 = scmp.ne.s32.totalorder %s37_s21, %s4073_s25  ;;  %p4079_p7 = scmp.lt.s32.totalorder %s4073_s25, %s4073_s25 }
  0x30   :  { %p4080_p8 = por %p4079_p7, %p4078_p6 }
  0x32   :  { %p4081_p9 = pnand %p4080_p8, %p4074_p5 }
  0x34   :  { %4084 = shalt.err (!%p4081_p9)
}
  0x35   :  { %s4142_s11 = smov 384   ;;  %s4143_s18 = smov 24  }
  0x36   :  { %42 = dma.hbm_to_vmem [thread:$0]  %s4729_s4, 12288, %s37_s21, [#allocation3], %s4142_s11, %s4142_s11, %s4143_s18  }
  0x37   :  { %s4144_s7 = smov [#allocation6]   ;;  %s4145_s30 = smov [#allocation9]  }
  0x38   :  { %s66_s29 = sshll.u32 %s4144_s7, 4  ;;  %s94_s15 = sshll.u32 %s4145_s30, 4  ;;  %s67_s29 = int_to_ptr.vmem [resolvable:$true] %s66_s29  ;;  %s95_s15 = int_to_ptr.vmem [resolvable:$true] %s94_s15 }
  0x39   :  { %s4085_s20 = scalar_lea.hbm %s4734_s9, 4096 }
  0x3a   :  { %p4086_p10 = scmp.ne.s32.totalorder %s4734_s9, %s4085_s20  ;;  %p4089_p11 = scmp.lt.u32.totalorder %s4085_s20, %s4734_s9 }
  0x3c   :  { %p4091_p12 = pnand %p4089_p11, %p4086_p10 }
  0x3e   :  { %4094 = shalt.err (!%p4091_p12)
}
  0x3f   :  { %s4095_s4 = scalar_lea.vmem %s67_s29, 4096  ;;  %p4100_p0 = scmp.lt.s32.totalorder %s67_s29, %s67_s29 }
  0x40   :  { %p4096_p13 = scmp.ne.s32.totalorder %s67_s29, %s4095_s4  ;;  %p4101_p1 = scmp.lt.s32.totalorder %s4095_s4, %s4095_s4 }
  0x42   :  { %p4102_p2 = por %p4101_p1, %p4100_p0 }
  0x44   :  { %p4103_p3 = pnand %p4102_p2, %p4096_p13 }
  0x46   :  { %4106 = shalt.err (!%p4103_p3)
}
  0x47   :  { %72 = dma.hbm_to_vmem [thread:$0]  %s4734_s9, 4096, %s67_s29, [#allocation5], %s4140_s19, %s4140_s19, %s4141_s28  }
  0x48   :  { %s4107_s27 = scalar_lea.hbm %s4738_s13, 1024 }
  0x49   :  { %p4108_p4 = scmp.ne.s32.totalorder %s4738_s13, %s4107_s27  ;;  %p4111_p5 = scmp.lt.u32.totalorder %s4107_s27, %s4738_s13 }
  0x4b   :  { %p4113_p6 = pnand %p4111_p5, %p4108_p4 }
  0x4d   :  { %4116 = shalt.err (!%p4113_p6)
}
  0x4e   :  { %s4117_s20 = scalar_lea.vmem %s95_s15, 1024  ;;  %p4122_p8 = scmp.lt.s32.totalorder %s95_s15, %s95_s15 }
  0x4f   :  { %p4118_p7 = scmp.ne.s32.totalorder %s95_s15, %s4117_s20  ;;  %p4123_p9 = scmp.lt.s32.totalorder %s4117_s20, %s4117_s20 }
  0x51   :  { %p4124_p10 = por %p4123_p9, %p4122_p8 }
  0x53   :  { %p4125_p11 = pnand %p4124_p10, %p4118_p7 }
  0x55   :  { %4128 = shalt.err (!%p4125_p11)
}
  0x56   :  { %100 = dma.hbm_to_vmem [thread:$0]  %s4738_s13, 1024, %s95_s15, [#allocation8], %s4140_s19, %s4140_s19, %s4141_s28  }
  0x57   :  { %4129 = dma.done.wait [#allocation3], 12288  }
  0x58   :  { %4130 = vsyncadd [#allocation3], 4294955008 }
  0x59   :  { %4131 = dma.done.wait [#allocation5], 8192  }
  0x5a   :  { %4132 = vsyncadd [#allocation5], 4294959104 }
  0x5b   :  { %4133 = dma.done.wait [#allocation8], 2048  }
  0x5c   :  { %4134 = vsyncadd [#allocation8], 4294965248  ;;  %v119_v0 = vld [vmem:[%s4725_s0] sm:$0xff]  ;;  %v120_v1 = vld [vmem:[%s4725_s0 + $0x8] sm:$0xff]  ;;  %v4146_v36 = vmov 0   ;;  %vm4148_vm0 = vmmov 0  }
  0x5d   :  { %123 = vadd.xlane.f32.xlu0 %v119_v0  ;;  %v3675_v2 = vld [vmem:[#allocation2 + $0x4] ss:$24 sps:$4 sm:$0xff]   ;;  %v3677_v3 = vld [vmem:[#allocation2] ss:$24 sps:$4 sm:$0xff]   ;;  %v3681_v6 = vld [vmem:[#allocation2 + $0x34] ss:$24 sps:$4 sm:$0xff]   ;;  %518 = vmatprep.mubr.bf16.mxu0 %v4146_v36 }
  0x5e   :  { %v3678_v4 = vld [vmem:[#allocation2 + $0xc] ss:$24 sps:$4 sm:$0xff]   ;;  %v3680_v5 = vld [vmem:[#allocation2 + $0x8] ss:$24 sps:$4 sm:$0xff]   ;;  %486 = vmatprep.subr.bf16.mxu0 %v3675_v2  ;;  %v3684_v8 = vld [vmem:[#allocation2 + $0x3c] ss:$24 sps:$4 sm:$0xff]   ;;  %561 = vmatprep.mubr.bf16.mxu1 %v4146_v36 }
  0x5f   :  { %v3683_v7 = vld [vmem:[#allocation2 + $0x30] ss:$24 sps:$4 sm:$0xff]   ;;  %529 = vmatprep.subr.bf16.mxu1 %v3678_v4  ;;  %487 = vmatpush1.bf16.msra.mxu0 %v3677_v3  ;;  %v3687_v18 = vld [vmem:[#allocation2 + $0x64] ss:$24 sps:$4 sm:$0xff]   ;;  %v3689_v19 = vld [vmem:[#allocation2 + $0x60] ss:$24 sps:$4 sm:$0xff]  }
  0x60   :  { %530 = vmatpush1.bf16.msra.mxu1 %v3680_v5  ;;  %488 = vmatprep.subr.bf16.mxu0 %v3681_v6  ;;  %v3686_v17 = vld [vmem:[#allocation2 + $0x38] ss:$24 sps:$4 sm:$0xff]   ;;  %v3690_v20 = vld [vmem:[#allocation2 + $0x6c] ss:$24 sps:$4 sm:$0xff]   ;;  %v3692_v21 = vld [vmem:[#allocation2 + $0x68] ss:$24 sps:$4 sm:$0xff]  }
  0x61   :  { %125 = vadd.xlane.f32.xlu0 %v120_v1  ;;  %531 = vmatprep.subr.bf16.mxu1 %v3684_v8  ;;  %v3693_v22 = vld [vmem:[#allocation2 + $0x94] ss:$24 sps:$4 sm:$0xff]   ;;  %v3695_v23 = vld [vmem:[#allocation2 + $0x90] ss:$24 sps:$4 sm:$0xff]   ;;  %v3699_v26 = vld [vmem:[#allocation2 + $0xc4] ss:$24 sps:$4 sm:$0xff]  }
  0x62   :  { %v3696_v24 = vld [vmem:[#allocation2 + $0x9c] ss:$24 sps:$4 sm:$0xff]   ;;  %v3698_v25 = vld [vmem:[#allocation2 + $0x98] ss:$24 sps:$4 sm:$0xff]   ;;  %v3702_v28 = vld [vmem:[#allocation2 + $0xcc] ss:$24 sps:$4 sm:$0xff]  }
  0x63   :  { %489 = vmatpush1.bf16.msra.mxu0 %v3683_v7  ;;  %v3701_v27 = vld [vmem:[#allocation2 + $0xc0] ss:$24 sps:$4 sm:$0xff]   ;;  %v3705_v30 = vld [vmem:[#allocation2 + $0xf4] ss:$24 sps:$4 sm:$0xff]   ;;  %v3707_v32 = vld [vmem:[#allocation2 + $0xf0] ss:$24 sps:$4 sm:$0xff]  }
  0x64   :  { %532 = vmatpush1.bf16.msra.mxu1 %v3686_v17  ;;  %490 = vmatprep.subr.bf16.mxu0 %v3687_v18  ;;  %v3704_v29 = vld [vmem:[#allocation2 + $0xc8] ss:$24 sps:$4 sm:$0xff]   ;;  %v3708_v31 = vld [vmem:[#allocation2 + $0xfc] ss:$24 sps:$4 sm:$0xff]   ;;  %v3710_v33 = vld [vmem:[#allocation2 + $0xf8] ss:$24 sps:$4 sm:$0xff]  }
  0x65   :  { %533 = vmatprep.subr.bf16.mxu1 %v3690_v20  ;;  %v3711_v34 = vld [vmem:[#allocation2 + $0x124] ss:$24 sps:$4 sm:$0xff]   ;;  %v3713_v37 = vld [vmem:[#allocation2 + $0x120] ss:$24 sps:$4 sm:$0xff]   ;;  %v3717_v39 = vld [vmem:[#allocation2 + $0x154] ss:$24 sps:$4 sm:$0xff]  }
  0x66   :  { %v3714_v35 = vld [vmem:[#allocation2 + $0x12c] ss:$24 sps:$4 sm:$0xff]   ;;  %v3716_v38 = vld [vmem:[#allocation2 + $0x128] ss:$24 sps:$4 sm:$0xff]   ;;  %v3720_v40 = vld [vmem:[#allocation2 + $0x15c] ss:$24 sps:$4 sm:$0xff]  }
  0x67   :  { %491 = vmatpush1.bf16.msra.mxu0 %v3689_v19  ;;  %v3719_v41 = vld [vmem:[#allocation2 + $0x150] ss:$24 sps:$4 sm:$0xff]   ;;  %v3725_v43 = vld [vmem:[#allocation2 + $0x14] ss:$24 sps:$4 sm:$0xff]   ;;  %v3119_v52 = vld [vmem:[%s4727_s2] ss:$0 sm:$0xff] }
  0x68   :  { %534 = vmatpush1.bf16.msra.mxu1 %v3692_v21  ;;  %492 = vmatprep.subr.bf16.mxu0 %v3693_v22  ;;  %v3722_v42 = vld [vmem:[#allocation2 + $0x158] ss:$24 sps:$4 sm:$0xff]   ;;  %v3120_v56 = vld [vmem:[%s4728_s3] ss:$0 sm:$0xff]  ;;  %v3728_v62 = vld [vmem:[#allocation2 + $0x44] ss:$24 sps:$4 sm:$0xff]  }
  0x69   :  { %535 = vmatprep.subr.bf16.mxu1 %v3696_v24  ;;  %v3723_v60 = vld [vmem:[#allocation2 + $0x10] ss:$24 sps:$4 sm:$0xff]   ;;  %v3726_v63 = vld [vmem:[#allocation2 + $0x40] ss:$24 sps:$4 sm:$0xff]   ;;  %v3734_v2 = vld [vmem:[#allocation2 + $0xa4] ss:$24 sps:$4 sm:$0xff]  }
  0x6a   :  { %v3732_v3 = vld [vmem:[#allocation2 + $0xa0] ss:$24 sps:$4 sm:$0xff]   ;;  %v3737_v4 = vld [vmem:[#allocation2 + $0xd4] ss:$24 sps:$4 sm:$0xff]   ;;  %v3735_v5 = vld [vmem:[#allocation2 + $0xd0] ss:$24 sps:$4 sm:$0xff]  }
  0x6b   :  { %493 = vmatpush1.bf16.msra.mxu0 %v3695_v23  ;;  %v3740_v6 = vld [vmem:[#allocation2 + $0x104] ss:$24 sps:$4 sm:$0xff]   ;;  %v3738_v7 = vld [vmem:[#allocation2 + $0x100] ss:$24 sps:$4 sm:$0xff]   ;;  %v3743_v8 = vld [vmem:[#allocation2 + $0x134] ss:$24 sps:$4 sm:$0xff]  }
  0x6c   :  { %536 = vmatpush1.bf16.msra.mxu1 %v3698_v25  ;;  %494 = vmatprep.subr.bf16.mxu0 %v3699_v26  ;;  %vm693_vm1 = vcmask 130048  }
  0x6d   :  { %537 = vmatprep.subr.bf16.mxu1 %v3702_v28 }
  0x6f   :  { %495 = vmatpush1.bf16.msra.mxu0 %v3701_v27 }
  0x70   :  { %538 = vmatpush1.bf16.msra.mxu1 %v3704_v29  ;;  %496 = vmatprep.subr.bf16.mxu0 %v3705_v30 }
  0x71   :  { %539 = vmatprep.subr.bf16.mxu1 %v3708_v31 }
  0x73   :  { %497 = vmatpush1.bf16.msra.mxu0 %v3707_v32 }
  0x74   :  { %540 = vmatpush1.bf16.msra.mxu1 %v3710_v33  ;;  %498 = vmatprep.subr.bf16.mxu0 %v3711_v34 }
  0x75   :  { %541 = vmatprep.subr.bf16.mxu1 %v3714_v35 }
  0x77   :  { %499 = vmatpush1.bf16.msra.mxu0 %v3713_v37 }
  0x78   :  { %542 = vmatpush1.bf16.msra.mxu1 %v3716_v38  ;;  %500 = vmatprep.subr.bf16.mxu0 %v3717_v39 }
  0x79   :  { %543 = vmatprep.subr.bf16.mxu1 %v3720_v40 }
  0x7b   :  { %501 = vmatpush1.bf16.msra.mxu0 %v3719_v41 }
  0x7c   :  { %544 = vmatpush1.bf16.msra.mxu1 %v3722_v42  ;;  %572 = vmatprep.subr.bf16.mxu0 %v3725_v43 }
  0xea   :  { %v124_v9 = vpop.xlane.xlu0 %123 }
  0xeb   :  { %v128_v10 = vmul.f32 0.0078125, %v124_v9  ;;  %v3741_v9 = vld [vmem:[#allocation2 + $0x130] ss:$24 sps:$4 sm:$0xff]  }
  0xed   :  { %v4304_v11 = vsub.f32 %v119_v0, %v128_v10  ;;  %v3731_v0 = vld [vmem:[#allocation2 + $0x74] ss:$24 sps:$4 sm:$0xff]   ;;  %v3746_v10 = vld [vmem:[#allocation2 + $0x164] ss:$24 sps:$4 sm:$0xff]  }
  0xee   :  { %v126_v12 = vpop.xlane.xlu0 %125 }
  0xef   :  { %v129_v13 = vmul.f32 0.0078125, %v126_v12  ;;  %v132_v14 = vmul.f32 %v4304_v11, %v4304_v11  ;;  %v4147_v12 = vmov 0.0  }
  0xf0   :  { %3487 = vmatprep.subr.bf16.mxu1 %v4147_v12 }
  0xf1   :  { %v4308_v15 = vsub.f32 %v120_v1, %v129_v13  ;;  %134 = vadd.xlane.f32.xlu1 %v132_v14  ;;  %v3729_v1 = vld [vmem:[#allocation2 + $0x70] ss:$24 sps:$4 sm:$0xff]   ;;  %v216_v13 = vlaneseq }
  0xf3   :  { %v133_v16 = vmul.f32 %v4308_v15, %v4308_v15  ;;  %v4336_v14 = vshrl.u32 %v216_v13, 7 }
  0xf5   :  { %136 = vadd.xlane.f32.xlu1 %v133_v16  ;;  %v214_v16 = vld [vmem:[%s4730_s5] sm:$0x3f]  ;;  %v4345_v17 = vsub.s32 1, %v4336_v14  ;;  %v4348_v18 = vsub.s32 2, %v4336_v14  ;;  %v4351_v19 = vsub.s32 3, %v4336_v14  ;;  %vm2838_vm3 = vcmp.lt.s32.totalorder %v4336_v14, 2 }
  0xf7   :  { %v223_v21 = vrot.slane %v214_v16, %v4345_v17  ;;  %v227_v22 = vrot.slane %v214_v16, %v4348_v18  ;;  %v231_v25 = vrot.slane %v214_v16, %v4351_v19 }
 0x17e   :  { %v135_v44 = vpop.xlane.xlu1 %134 }
 0x17f   :  { %v138_v45 = vmul.f32 0.0078125, %v135_v44 }
 0x181   :  { %v140_v46 = vadd.f32 1e-12, %v138_v45 }
 0x182   :  { %v137_v47 = vpop.xlane.xlu1 %136 }
 0x183   :  { %3947 = vrsqrt.f32 %v140_v46  ;;  %v139_v48 = vmul.f32 0.0078125, %v137_v47 }
 0x185   :  { %v141_v49 = vadd.f32 1e-12, %v139_v48 }
 0x187   :  { %3949 = vrsqrt.f32 %v141_v49  ;;  %v4373_v49 = vsub.s32 4, %v4336_v14 }
 0x18d   :  { %v3948_v50 = vpop.eup %3947 }
 0x18e   :  { %v144_v51 = vmul.f32 %v3948_v50, %v4304_v11  ;;  %v3744_v11 = vld [vmem:[#allocation2 + $0x160] ss:$24 sps:$4 sm:$0xff]   ;;  %v4376_v50 = vsub.s32 5, %v4336_v14 }
 0x190   :  { %v152_v55 = vmul.f32 %v3119_v52, %v144_v51  ;;  %v235_v51 = vrot.slane %v214_v16, %v4373_v49 }
 0x191   :  { %v3950_v53 = vpop.eup %3949 }
 0x192   :  { %v145_v54 = vmul.f32 %v3950_v53, %v4308_v15  ;;  %v4322_v58 = vadd.f32 %v3120_v56, %v152_v55  ;;  %v4339_v15 = vsub.s32 0, %v4336_v14  ;;  %v239_v53 = vrot.slane %v214_v16, %v4376_v50 }
 0x194   :  { %v153_v57 = vmul.f32 %v3119_v52, %v145_v54  ;;  %v219_v20 = vrot.slane %v214_v16, %v4339_v15 }
 0x196   :  { %v4324_v59 = vadd.f32 %v3120_v56, %v153_v57 }
 0x198   :  { %v213_v61 = vpack.c.bf16 %v4324_v59, %v4322_v58 }
 0x19a   :  { %519 = vmatmul.mubr.bf16.vlgmr.msra.gmra.mrb[0].mxu0 %v213_v61  ;;  %562 = vmatmul.mubr.bf16.vlgmr.msra.gmra.mrb[0].mxu1 %v213_v61 }
 0x19b   :  { %573 = vmatpush1.bf16.msra.mxu0 %v3723_v60  ;;  %604 = vmatprep.mubr.bf16.mxu0 %v4146_v36 }
 0x19c   :  { %574 = vmatprep.subr.bf16.mxu0 %v3728_v62  ;;  %3489 = vmatprep.mubr.msk.bf16.mxu1 %vm4148_vm0, %v4147_v12 }
 0x19f   :  { %575 = vmatpush1.bf16.msra.mxu0 %v3726_v63 }
 0x1a0   :  { %576 = vmatprep.subr.bf16.mxu0 %v3731_v0 }
 0x1a3   :  { %577 = vmatpush1.bf16.msra.mxu0 %v3729_v1  ;;  %v4384_v1 = vld [vmem:[%s4726_s1] sm:$0xff] }
 0x1a4   :  { %578 = vmatprep.subr.bf16.mxu0 %v3734_v2 }
 0x1a7   :  { %579 = vmatpush1.bf16.msra.mxu0 %v3732_v3  ;;  %v4389_v3 = vld [vmem:[%s4726_s1 + $0x8] sm:$0xff] }
 0x1a8   :  { %580 = vmatprep.subr.bf16.mxu0 %v3737_v4 }
 0x1ab   :  { %581 = vmatpush1.bf16.msra.mxu0 %v3735_v5 }
 0x1ac   :  { %582 = vmatprep.subr.bf16.mxu0 %v3740_v6 }
 0x1af   :  { %583 = vmatpush1.bf16.msra.mxu0 %v3738_v7 }
 0x1b0   :  { %584 = vmatprep.subr.bf16.mxu0 %v3743_v8 }
 0x1b3   :  { %585 = vmatpush1.bf16.msra.mxu0 %v3741_v9 }
 0x1b4   :  { %586 = vmatprep.subr.bf16.mxu0 %v3746_v10 }
 0x1b7   :  { %587 = vmatpush1.bf16.msra.mxu0 %v3744_v11 }
 0x1b8   :  { %3511 = vmatprep.subr.bf16.mxu0 %v4147_v12 }
 0x1ba   :  { %605 = vmatmul.mubr.bf16.vlgmr.msra.gmra.mrb[4].mxu0 %v213_v61 }
 0x1bb   :  { %3527 = vmatprep.mubr.msk.bf16.mxu0 %vm4148_vm0, %v4147_v12 }
 0x26d   :  { %v520_v23 = vpop.f32.mrb[0].mxu0  ;;  %v563_v24 = vpop.f32.mrb[0].mxu1 }
 0x26e   :  { %v521_v26 = vadd.f32 %v520_v23, %v219_v20  ;;  %v522_v27 = vpop.f32.mrb[1].mxu0  ;;  %v565_v28 = vpop.f32.mrb[1].mxu1  ;;  %v564_v32 = vadd.f32 %v563_v24, %v227_v22 }
 0x26f   :  { %v523_v29 = vadd.f32 %v522_v27, %v223_v21  ;;  %v524_v30 = vpop.f32.mrb[2].mxu0  ;;  %v567_v31 = vpop.f32.mrb[2].mxu1  ;;  %v4357_v38 = vadd.f32 %v565_v28, %v231_v25 }
 0x270   :  { %v525_v33 = vadd.f32 %v524_v30, %v219_v20  ;;  %v568_v34 = vadd.f32 %v567_v31, %v227_v22  ;;  %v526_v35 = vpop.f32.mrb[3].mxu0  ;;  %v569_v37 = vpop.f32.mrb[3].mxu1  ;;  %v647_v41 = vmul.f32 0.125, %v521_v26 }
 0x271   :  { %v527_v39 = vadd.f32 %v526_v35, %v223_v21  ;;  %v4359_v40 = vadd.f32 %v569_v37, %v231_v25  ;;  %v4361_v44 = vmul.f32 0.125, %v523_v29 }
 0x272   :  { %v648_v42 = vmul.f32 0.125, %v525_v33  ;;  %v650_v43 = vpack.c.bf16 %v568_v34, %v564_v32 }
 0x273   :  { %v4363_v45 = vmul.f32 0.125, %v527_v39  ;;  %v765_v46 = vpack.c.bf16 %v4359_v40, %v4357_v38 }
 0x274   :  { %v649_v47 = vpack.c.bf16 %v648_v42, %v647_v41  ;;  %3488 = vmatpush3.bf16.xpose.msra.mxu1 %v650_v43 }
 0x275   :  { %v764_v48 = vpack.c.bf16 %v4363_v45, %v4361_v44  ;;  %3493 = vmatprep.subr.bf16.mxu1 %v4147_v12 }
 0x27b   :  { %3490 = vmatmul.mubr.bf16.vlgmr.msra.gmra.mrb[4].mxu1 %v649_v47 }
 0x27c   :  { %3495 = vmatprep.mubr.msk.bf16.mxu1 %vm4148_vm0, %v4147_v12 }
 0x28d   :  { %v606_v52 = vpop.f32.mrb[4].mxu0 }
 0x28e   :  { %v608_v54 = vpop.f32.mrb[5].mxu0  ;;  %v607_v56 = vadd.f32 %v606_v52, %v235_v51 }
 0x28f   :  { %v610_v55 = vpop.f32.mrb[6].mxu0  ;;  %v609_v61 = vadd.f32 %v608_v54, %v239_v53 }
 0x290   :  { %v611_v57 = vadd.f32 %v610_v55, %v235_v51  ;;  %v612_v60 = vpop.f32.mrb[7].mxu0 }
 0x291   :  { %v613_v62 = vadd.f32 %v612_v60, %v239_v53 }
 0x292   :  { %v651_v63 = vpack.c.bf16 %v611_v57, %v607_v56 }
 0x293   :  { %v766_v0 = vpack.c.bf16 %v613_v62, %v609_v61 }
 0x294   :  { %3494 = vmatpush3.bf16.msra.mxu1 %v651_v63  ;;  %v3755_v63 = vld [vmem:[%s4731_s6 + $0x40] sm:$0xff]  }
 0x295   :  { %3499 = vmatprep.subr.bf16.mxu1 %v4147_v12  ;;  %3512 = vmatpush3.bf16.msra.mxu0 %v3755_v63 }
 0x296   :  { %3513 = vmatprep.subr.bf16.mxu0 %v4147_v12 }
 0x34e   :  { %v686_v2 = vpop.f32.mrb[4].mxu1 }
 0x34f   :  { %v687_v4 = vadd.f32 %v686_v2, %v4384_v1  ;;  %v3491_v5 = vpop.f32.mrb[5].mxu1  ;;  %v3757_v2 = vld [vmem:[%s4731_s6 + $0x50] sm:$0xff]  }
 0x350   :  { %v689_v6 = vpop.f32.mrb[6].mxu1  ;;  %v3759_v5 = vld [vmem:[%s4731_s6 + $0x60] sm:$0xff]  }
 0x351   :  { %v690_v7 = vadd.f32 %v689_v6, %v4389_v3  ;;  %v3492_v8 = vpop.f32.mrb[7].mxu1  ;;  %v694_v9 = vsel %vm693_vm1, %v687_v4, -inf  ;;  %v3760_v6 = vld [vmem:[%s4731_s6 + $0x68] sm:$0xff]  }
 0x352   :  { %695 = vmax.xlane.f32.xlu0 %v694_v9 }
 0x353   :  { %v697_v10 = vsel %vm693_vm1, %v690_v7, -inf }
 0x354   :  { %698 = vmax.xlane.f32.xlu1 %v697_v10 }
 0x3df   :  { %v696_v11 = vpop.xlane.xlu0 %695 }
 0x3e0   :  { %v700_v16 = vsub.f32 %v687_v4, %v696_v11  ;;  %v3758_v4 = vld [vmem:[%s4731_s6 + $0x58] sm:$0xff]  }
 0x3e1   :  { %v699_v20 = vpop.xlane.xlu1 %698 }
 0x3e2   :  { %v702_v21 = vmul.f32 1.442695, %v700_v16  ;;  %v701_v22 = vsub.f32 %v690_v7, %v699_v20  ;;  %v3761_v7 = vld [vmem:[%s4731_s6 + $0x70] sm:$0xff]  }
 0x3e4   :  { %3951 = vpow2.f32 %v702_v21  ;;  %v704_v23 = vmul.f32 1.442695, %v701_v22  ;;  %v3747_v21 = vld [vmem:[%s4731_s6] sm:$0xff]  }
 0x3e6   :  { %3953 = vpow2.f32 %v704_v23  ;;  %v3748_v23 = vld [vmem:[%s4731_s6 + $0x8] sm:$0xff]  }
 0x3ee   :  { %v3952_v24 = vpop.eup %3951 }
 0x3ef   :  { %v706_v25 = vsel %vm693_vm1, %v3952_v24, 0.0 }
 0x3f0   :  { %v3954_v26 = vpop.eup %3953  ;;  %707 = vadd.xlane.f32.xlu0 %v706_v25  ;;  %v3750_v25 = vld [vmem:[%s4731_s6 + $0x18] sm:$0xff]  }
 0x3f1   :  { %v709_v27 = vsel %vm693_vm1, %v3954_v26, 0.0 }
 0x3f2   :  { %710 = vadd.xlane.f32.xlu1 %v709_v27  ;;  %v3752_v27 = vld [vmem:[%s4731_s6 + $0x28] sm:$0xff]  }
 0x47d   :  { %v708_v28 = vpop.xlane.xlu0 %707 }
 0x47e   :  { %3955 = vrcp.f32 %v708_v28  ;;  %v3753_v28 = vld [vmem:[%s4731_s6 + $0x30] sm:$0xff]  }
 0x47f   :  { %v711_v29 = vpop.xlane.xlu1 %710 }
 0x480   :  { %3957 = vrcp.f32 %v711_v29  ;;  %v3754_v29 = vld [vmem:[%s4731_s6 + $0x38] sm:$0xff]  }
 0x488   :  { %v3956_v30 = vpop.eup %3955 }
 0x489   :  { %v714_v32 = vmul.f32 %v3956_v30, %v3952_v24  ;;  %v3749_v24 = vld [vmem:[%s4731_s6 + $0x10] sm:$0xff]   ;;  %v3762_v30 = vld [vmem:[%s4731_s6 + $0x78] sm:$0xff]  }
 0x48a   :  { %v3958_v31 = vpop.eup %3957 }
 0x48b   :  { %v715_v33 = vmul.f32 %v3958_v31, %v3954_v26  ;;  %v3751_v26 = vld [vmem:[%s4731_s6 + $0x20] sm:$0xff]  }
 0x48d   :  { %v716_v34 = vpack.c.bf16 %v715_v33, %v714_v32 }
 0x48f   :  { %3496 = vmatmul.mubr.msk.bf16.vlgmr.msra.gmra.mrb[8].mxu1 %vm693_vm1, %v716_v34 }
 0x490   :  { %3500 = vmatpush3.bf16.xpose.msra.mxu1 %v765_v46  ;;  %3501 = vmatprep.mubr.msk.bf16.mxu1 %vm4148_vm0, %v4147_v12 }
 0x491   :  { %3505 = vmatprep.subr.bf16.mxu1 %v4147_v12 }
 0x497   :  { %3502 = vmatmul.mubr.bf16.vlgmr.msra.gmra.mrb[12].mxu1 %v764_v48 }
 0x498   :  { %3506 = vmatpush3.bf16.msra.mxu1 %v766_v0  ;;  %3507 = vmatprep.mubr.msk.bf16.mxu1 %vm4148_vm0, %v4147_v12  ;;  %v3756_v0 = vld [vmem:[%s4731_s6 + $0x48] sm:$0xff]  }
 0x499   :  { %3531 = vmatprep.subr.bf16.mxu1 %v4147_v12  ;;  %3514 = vmatpush3.bf16.msra.mxu0 %v3756_v0 }
 0x49a   :  { %3515 = vmatprep.subr.bf16.mxu0 %v4147_v12 }
 0x49d   :  { %3516 = vmatpush3.bf16.msra.mxu0 %v3757_v2 }
 0x49e   :  { %3517 = vmatprep.subr.bf16.mxu0 %v4147_v12 }
 0x4a1   :  { %3518 = vmatpush3.bf16.msra.mxu0 %v3758_v4 }
 0x4a2   :  { %3519 = vmatprep.subr.bf16.mxu0 %v4147_v12 }
 0x4a5   :  { %3520 = vmatpush3.bf16.msra.mxu0 %v3759_v5 }
 0x4a6   :  { %3521 = vmatprep.subr.bf16.mxu0 %v4147_v12 }
 0x4a9   :  { %3522 = vmatpush3.bf16.msra.mxu0 %v3760_v6  ;;  %v3769_v6 = vld [vmem:[#allocation4 + $0x20] ss:$8 sps:$4 sm:$0xff]  }
 0x4aa   :  { %3523 = vmatprep.subr.bf16.mxu0 %v4147_v12 }
 0x4ad   :  { %3524 = vmatpush3.bf16.msra.mxu0 %v3761_v7  ;;  %v3774_v7 = vld [vmem:[#allocation4 + $0x34] ss:$8 sps:$4 sm:$0xff]  }
 0x4ae   :  { %3525 = vmatprep.subr.bf16.mxu0 %v4147_v12 }
 0x4b1   :  { %3526 = vmatpush3.bf16.msra.mxu0 %v3762_v30 }
 0x562   :  { %v4404_v35 = vpop.f32.mrb[8].mxu1 }
 0x563   :  { %v3497_v37 = vpop.f32.mrb[9].mxu1 }
 0x564   :  { %v4406_v38 = vpop.f32.mrb[10].mxu1 }
 0x565   :  { %v761_v39 = vpack.c.bf16 %v4406_v38, %v4404_v35  ;;  %v3498_v40 = vpop.f32.mrb[11].mxu1  ;;  %v4488_v35 = vld [vmem:[%s4735_s10] sm:$0xff] }
 0x566   :  { %v1057_v38 = vrot.slane %v4488_v35, %v4339_v15  ;;  %v1087_v30 = vrot.slane %v4488_v35, %v4345_v17 }
 0x56a   :  { %v801_v41 = vpop.f32.mrb[12].mxu1 }
 0x56b   :  { %v802_v42 = vadd.f32 %v801_v41, %v4384_v1  ;;  %v3503_v43 = vpop.f32.mrb[13].mxu1 }
 0x56c   :  { %v804_v44 = vpop.f32.mrb[14].mxu1 }
 0x56d   :  { %v805_v45 = vadd.f32 %v804_v44, %v4389_v3  ;;  %v3504_v46 = vpop.f32.mrb[15].mxu1  ;;  %v808_v47 = vsel %vm693_vm1, %v802_v42, -inf }
 0x56e   :  { %809 = vmax.xlane.f32.xlu0 %v808_v47 }
 0x56f   :  { %v811_v48 = vsel %vm693_vm1, %v805_v45, -inf }
 0x570   :  { %812 = vmax.xlane.f32.xlu1 %v811_v48 }
 0x5fb   :  { %v810_v51 = vpop.xlane.xlu0 %809 }
 0x5fc   :  { %v814_v52 = vsub.f32 %v802_v42, %v810_v51 }
 0x5fd   :  { %v813_v53 = vpop.xlane.xlu1 %812 }
 0x5fe   :  { %v816_v54 = vmul.f32 1.442695, %v814_v52  ;;  %v815_v55 = vsub.f32 %v805_v45, %v813_v53 }
 0x600   :  { %3959 = vpow2.f32 %v816_v54  ;;  %v818_v56 = vmul.f32 1.442695, %v815_v55  ;;  %v3763_v55 = vld [vmem:[#allocation4] ss:$8 sps:$4 sm:$0xff]  }
 0x602   :  { %3961 = vpow2.f32 %v818_v56  ;;  %v3765_v56 = vld [vmem:[#allocation4 + $0x4] ss:$8 sps:$4 sm:$0xff]  }
 0x603   :  { %1205 = vmatprep.subr.bf16.mxu0 %v3765_v56  ;;  %v3798_v56 = vld [vmem:[#allocation6 + $0x28] sm:$0xff]  }
 0x60a   :  { %v3960_v57 = vpop.eup %3959 }
 0x60b   :  { %v820_v60 = vsel %vm693_vm1, %v3960_v57, 0.0 }
 0x60c   :  { %v3962_v61 = vpop.eup %3961  ;;  %821 = vadd.xlane.f32.xlu0 %v820_v60  ;;  %v3766_v60 = vld [vmem:[#allocation4 + $0x10] ss:$8 sps:$4 sm:$0xff]  }
 0x60d   :  { %v823_v62 = vsel %vm693_vm1, %v3962_v61, 0.0 }
 0x60e   :  { %824 = vadd.xlane.f32.xlu1 %v823_v62 }
 0x699   :  { %v822_v8 = vpop.xlane.xlu0 %821 }
 0x69a   :  { %3963 = vrcp.f32 %v822_v8  ;;  %v3772_v8 = vld [vmem:[#allocation4 + $0x30] ss:$8 sps:$4 sm:$0xff]  }
 0x69b   :  { %v825_v9 = vpop.xlane.xlu1 %824 }
 0x69c   :  { %3965 = vrcp.f32 %v825_v9  ;;  %v3777_v9 = vld [vmem:[#allocation4 + $0x44] ss:$8 sps:$4 sm:$0xff]  }
 0x6a4   :  { %v3964_v10 = vpop.eup %3963 }
 0x6a5   :  { %v828_v16 = vmul.f32 %v3964_v10, %v3960_v57  ;;  %v3768_v57 = vld [vmem:[#allocation4 + $0x14] ss:$8 sps:$4 sm:$0xff]   ;;  %v3775_v10 = vld [vmem:[#allocation4 + $0x40] ss:$8 sps:$4 sm:$0xff]  }
 0x6a6   :  { %v3966_v11 = vpop.eup %3965 }
 0x6a7   :  { %v829_v20 = vmul.f32 %v3966_v11, %v3962_v61  ;;  %v3780_v11 = vld [vmem:[#allocation4 + $0x54] ss:$8 sps:$4 sm:$0xff]  }
 0x6a9   :  { %v830_v22 = vpack.c.bf16 %v829_v20, %v828_v16  ;;  %v3778_v16 = vld [vmem:[#allocation4 + $0x50] ss:$8 sps:$4 sm:$0xff]   ;;  %v3783_v20 = vld [vmem:[#allocation4 + $0x64] ss:$8 sps:$4 sm:$0xff]  }
 0x6ab   :  { %3508 = vmatmul.mubr.msk.bf16.vlgmr.msra.gmra.mrb[16].mxu1 %vm693_vm1, %v830_v22  ;;  %v3786_v22 = vld [vmem:[#allocation4 + $0x74] ss:$8 sps:$4 sm:$0xff]  }
 0x6ac   :  { %3532 = vmatpush3.bf16.msra.mxu1 %v3747_v21  ;;  %3547 = vmatprep.mubr.msk.bf16.mxu1 %vm4148_vm0, %v4147_v12  ;;  %v3781_v21 = vld [vmem:[#allocation4 + $0x60] ss:$8 sps:$4 sm:$0xff]  }
 0x6ad   :  { %3533 = vmatprep.subr.bf16.mxu1 %v4147_v12 }
 0x6b0   :  { %3534 = vmatpush3.bf16.msra.mxu1 %v3748_v23  ;;  %v3784_v23 = vld [vmem:[#allocation4 + $0x70] ss:$8 sps:$4 sm:$0xff]  }
 0x6b1   :  { %3535 = vmatprep.subr.bf16.mxu1 %v4147_v12 }
 0x6b4   :  { %3536 = vmatpush3.bf16.msra.mxu1 %v3749_v24 }
 0x6b5   :  { %3537 = vmatprep.subr.bf16.mxu1 %v4147_v12 }
 0x6b8   :  { %3538 = vmatpush3.bf16.msra.mxu1 %v3750_v25 }
 0x6b9   :  { %3539 = vmatprep.subr.bf16.mxu1 %v4147_v12 }
 0x6bc   :  { %3540 = vmatpush3.bf16.msra.mxu1 %v3751_v26 }
 0x6bd   :  { %3541 = vmatprep.subr.bf16.mxu1 %v4147_v12 }
 0x6c0   :  { %3542 = vmatpush3.bf16.msra.mxu1 %v3752_v27 }
 0x6c1   :  { %3543 = vmatprep.subr.bf16.mxu1 %v4147_v12 }
 0x6c4   :  { %3544 = vmatpush3.bf16.msra.mxu1 %v3753_v28 }
 0x6c5   :  { %3545 = vmatprep.subr.bf16.mxu1 %v4147_v12 }
 0x6c8   :  { %3546 = vmatpush3.bf16.msra.mxu1 %v3754_v29 }
 0x6cb   :  { %3548 = vmatmul.mubr.bf16.vlgmr.msra.gmra.mrb[20].mxu1 %v761_v39 }
 0x77e   :  { %v868_v31 = vpop.f32.mrb[16].mxu1 }
 0x77f   :  { %v3509_v32 = vpop.f32.mrb[17].mxu1 }
 0x780   :  { %v871_v33 = vpop.f32.mrb[18].mxu1 }
 0x781   :  { %v875_v34 = vpack.c.bf16 %v871_v33, %v868_v31  ;;  %v3510_v37 = vpop.f32.mrb[19].mxu1 }
 0x783   :  { %3528 = vmatmul.mubr.bf16.vlgmr.msra.gmra.mrb[8].mxu0 %v875_v34 }
 0x784   :  { %1237 = vmatprep.mubr.bf16.mxu0 %v4146_v36  ;;  %1206 = vmatpush1.bf16.msra.mxu0 %v3763_v55  ;;  %v3797_v55 = vld [vmem:[#allocation6 + $0x68] sm:$0xff]  }
 0x785   :  { %1207 = vmatprep.subr.bf16.mxu0 %v3768_v57  ;;  %v3799_v57 = vld [vmem:[#allocation6 + $0x70] sm:$0xff]  }
 0x788   :  { %1208 = vmatpush1.bf16.msra.mxu0 %v3766_v60  ;;  %v3800_v60 = vld [vmem:[#allocation6 + $0x30] sm:$0xff]  }
 0x79e   :  { %v1047_v40 = vpop.f32.mrb[20].mxu1 }
 0x79f   :  { %v3549_v41 = vpop.f32.mrb[21].mxu1 }
 0x7a0   :  { %v1050_v42 = vpop.f32.mrb[22].mxu1 }
 0x7a1   :  { %v3550_v43 = vpop.f32.mrb[23].mxu1 }
 0x856   :  { %v958_v39 = vpop.f32.mrb[8].mxu0 }
 0x857   :  { %v1048_v44 = vadd.f32 %v1047_v40, %v958_v39  ;;  %v3529_v45 = vpop.f32.mrb[9].mxu0  ;;  %v1093_v40 = vrot.slane %v4488_v35, %v4348_v18  ;;  %v3787_v39 = vld [vmem:[#allocation6 + $0x40] sm:$0xff]  }
 0x858   :  { %v961_v46 = vpop.f32.mrb[10].mxu0  ;;  %3397 = vmatprep.subr.bf16.mxu1 %v3787_v39  ;;  %v3789_v45 = vld [vmem:[#allocation6 + $0x48] sm:$0xff]  }
 0x859   :  { %v1058_v47 = vadd.f32 %v1057_v38, %v1048_v44  ;;  %v1051_v48 = vadd.f32 %v1050_v42, %v961_v46  ;;  %v3530_v51 = vpop.f32.mrb[11].mxu0  ;;  %v3788_v44 = vld [vmem:[#allocation6] sm:$0xff]   ;;  %v3790_v46 = vld [vmem:[#allocation6 + $0x8] sm:$0xff]  }
 0x85a   :  { %3398 = vmatpush3.bf16.msra.mxu1 %v3788_v44  ;;  %v3793_v51 = vld [vmem:[#allocation6 + $0x58] sm:$0xff]  }
 0x85b   :  { %v1059_v52 = vadd.f32 %v1057_v38, %v1051_v48  ;;  %v1060_v53 = vadd.f32 %v1058_v47, %v4322_v58  ;;  %3399 = vmatprep.subr.bf16.mxu1 %v3789_v45  ;;  %v3791_v47 = vld [vmem:[#allocation6 + $0x50] sm:$0xff]  }
 0x85c   :  { %v3792_v48 = vld [vmem:[#allocation6 + $0x10] sm:$0xff]  }
 0x85d   :  { %1062 = vadd.xlane.f32.xlu0 %v1060_v53  ;;  %v1061_v54 = vadd.f32 %v1059_v52, %v4324_v59  ;;  %v3771_v59 = vld [vmem:[#allocation4 + $0x24] ss:$8 sps:$4 sm:$0xff]   ;;  %v3794_v52 = vld [vmem:[#allocation6 + $0x18] sm:$0xff]  }
 0x85e   :  { %1209 = vmatprep.subr.bf16.mxu0 %v3771_v59  ;;  %3400 = vmatpush3.bf16.msra.mxu1 %v3790_v46 }
 0x85f   :  { %1064 = vadd.xlane.f32.xlu1 %v1061_v54  ;;  %1210 = vmatpush1.bf16.msra.mxu0 %v3769_v6 }
 0x860   :  { %1211 = vmatprep.subr.bf16.mxu0 %v3774_v7  ;;  %3401 = vmatprep.subr.bf16.mxu1 %v3791_v47 }
 0x862   :  { %3402 = vmatpush3.bf16.msra.mxu1 %v3792_v48 }
 0x863   :  { %1212 = vmatpush1.bf16.msra.mxu0 %v3772_v8  ;;  %3403 = vmatprep.subr.bf16.mxu1 %v3793_v51 }
 0x864   :  { %1213 = vmatprep.subr.bf16.mxu0 %v3777_v9 }
 0x866   :  { %3404 = vmatpush3.bf16.msra.mxu1 %v3794_v52 }
 0x867   :  { %1214 = vmatpush1.bf16.msra.mxu0 %v3775_v10 }
 0x868   :  { %1215 = vmatprep.subr.bf16.mxu0 %v3780_v11 }
 0x86b   :  { %1216 = vmatpush1.bf16.msra.mxu0 %v3778_v16 }
 0x86c   :  { %1217 = vmatprep.subr.bf16.mxu0 %v3783_v20 }
 0x86f   :  { %1218 = vmatpush1.bf16.msra.mxu0 %v3781_v21 }
 0x870   :  { %1219 = vmatprep.subr.bf16.mxu0 %v3786_v22 }
 0x873   :  { %1220 = vmatpush1.bf16.msra.mxu0 %v3784_v23 }
 0x8ea   :  { %v1063_v61 = vpop.xlane.xlu0 %1062 }
 0x8eb   :  { %v1066_v62 = vmul.f32 0.0078125, %v1063_v61  ;;  %v3801_v61 = vld [vmem:[#allocation6 + $0x78] sm:$0xff]  }
 0x8ec   :  { %v1065_v63 = vpop.xlane.xlu1 %1064 }
 0x8ed   :  { %v1068_v0 = vsub.f32 %v1060_v53, %v1066_v62  ;;  %v1067_v2 = vmul.f32 0.0078125, %v1065_v63  ;;  %v3795_v53 = vld [vmem:[#allocation6 + $0x60] sm:$0xff]   ;;  %v3802_v62 = vld [vmem:[#allocation6 + $0x38] sm:$0xff]  }
 0x8ee   :  { %3405 = vmatprep.subr.bf16.mxu1 %v3795_v53  ;;  %v1113_v63 = vld [vmem:[%s4733_s8] sm:$0x3] }
 0x8ef   :  { %v1069_v4 = vsub.f32 %v1061_v54, %v1067_v2  ;;  %v1070_v5 = vmul.f32 %v1068_v0, %v1068_v0  ;;  %v3796_v54 = vld [vmem:[#allocation6 + $0x20] sm:$0xff]   ;;  %v1122_v2 = vrot.slane %v1113_v63, %v4345_v17 }
 0x8f0   :  { %3406 = vmatpush3.bf16.msra.mxu1 %v3796_v54 }
 0x8f1   :  { %1072 = vadd.xlane.f32.xlu0 %v1070_v5  ;;  %v1071_v58 = vmul.f32 %v1069_v4, %v1069_v4  ;;  %3407 = vmatprep.subr.bf16.mxu1 %v3797_v55 }
 0x8f3   :  { %1074 = vadd.xlane.f32.xlu1 %v1071_v58 }
 0x8f4   :  { %3408 = vmatpush3.bf16.msra.mxu1 %v3798_v56 }
 0x8f5   :  { %3409 = vmatprep.subr.bf16.mxu1 %v3799_v57 }
 0x8f8   :  { %3410 = vmatpush3.bf16.msra.mxu1 %v3800_v60 }
 0x8f9   :  { %3411 = vmatprep.subr.bf16.mxu1 %v3801_v61 }
 0x8fc   :  { %3412 = vmatpush3.bf16.msra.mxu1 %v3802_v62 }
 0x97e   :  { %v1073_v24 = vpop.xlane.xlu0 %1072 }
 0x97f   :  { %v1076_v25 = vmul.f32 0.0078125, %v1073_v24 }
 0x980   :  { %v1075_v26 = vpop.xlane.xlu1 %1074 }
 0x981   :  { %v1078_v27 = vadd.f32 1e-12, %v1076_v25  ;;  %v1077_v28 = vmul.f32 0.0078125, %v1075_v26 }
 0x983   :  { %3967 = vrsqrt.f32 %v1078_v27  ;;  %v1079_v29 = vadd.f32 1e-12, %v1077_v28 }
 0x985   :  { %3969 = vrsqrt.f32 %v1079_v29 }
 0x98d   :  { %v3968_v31 = vpop.eup %3967 }
 0x98e   :  { %v1082_v32 = vmul.f32 %v3968_v31, %v1068_v0  ;;  %v1118_v0 = vrot.slane %v1113_v63, %v4339_v15 }
 0x98f   :  { %v3970_v33 = vpop.eup %3969 }
 0x990   :  { %v1083_v34 = vmul.f32 %v3970_v33, %v1069_v4  ;;  %v1088_v37 = vmul.f32 %v1087_v30, %v1082_v32 }
 0x992   :  { %v1089_v41 = vmul.f32 %v1087_v30, %v1083_v34  ;;  %v4498_v42 = vadd.f32 %v1093_v40, %v1088_v37 }
 0x994   :  { %v4500_v43 = vadd.f32 %v1093_v40, %v1089_v41 }
 0x996   :  { %v1112_v38 = vpack.c.bf16 %v4500_v43, %v4498_v42 }
 0x998   :  { %1238 = vmatmul.mubr.bf16.vlgmr.msra.gmra.mrb[12].mxu0 %v1112_v38 }
 0x999   :  { %1852 = vmatprep.mubr.bf16.mxu0 %v4146_v36 }
 0xa6b   :  { %v1239_v4 = vpop.f32.mrb[12].mxu0 }
 0xa6c   :  { %v1240_v5 = vadd.f32 %v1239_v4, %v1118_v0  ;;  %v1241_v58 = vpop.f32.mrb[13].mxu0 }
 0xa6d   :  { %v1242_v59 = vadd.f32 %v1241_v58, %v1122_v2  ;;  %v1243_v6 = vpop.f32.mrb[14].mxu0 }
 0xa6e   :  { %v1252_v7 = vmul.f32 0.044715, %v1240_v5  ;;  %v1244_v8 = vadd.f32 %v1243_v6, %v1118_v0  ;;  %v1245_v9 = vpop.f32.mrb[15].mxu0  ;;  %v1248_v47 = vmul.f32 0.5, %v1240_v5  ;;  %v1321_v0 = vrot.slane %v4488_v35, %v4351_v19 }
 0xa6f   :  { %v1253_v10 = vmul.f32 0.044715, %v1242_v59  ;;  %v1246_v11 = vadd.f32 %v1245_v9, %v1122_v2  ;;  %v1249_v52 = vmul.f32 0.5, %v1242_v59 }
 0xa70   :  { %v1256_v16 = vmul.f32 %v1252_v7, %v1240_v5  ;;  %v1254_v20 = vmul.f32 0.044715, %v1244_v8  ;;  %v1250_v48 = vmul.f32 0.5, %v1244_v8 }
 0xa71   :  { %v1257_v21 = vmul.f32 %v1253_v10, %v1242_v59  ;;  %v1255_v22 = vmul.f32 0.044715, %v1246_v11  ;;  %v1251_v53 = vmul.f32 0.5, %v1246_v11  ;;  %v3803_v10 = vld [vmem:[#allocation2 + $0x180] ss:$24 sps:$4 sm:$0xff]  }
 0xa72   :  { %v1260_v23 = vmul.f32 %v1256_v16, %v1240_v5  ;;  %v1258_v24 = vmul.f32 %v1254_v20, %v1244_v8  ;;  %v3806_v16 = vld [vmem:[#allocation2 + $0x188] ss:$24 sps:$4 sm:$0xff]   ;;  %v3808_v20 = vld [vmem:[#allocation2 + $0x18c] ss:$24 sps:$4 sm:$0xff]  }
 0xa73   :  { %v1261_v25 = vmul.f32 %v1257_v21, %v1242_v59  ;;  %v1259_v26 = vmul.f32 %v1255_v22, %v1246_v11  ;;  %v3811_v21 = vld [vmem:[#allocation2 + $0x1b4] ss:$24 sps:$4 sm:$0xff]   ;;  %1863 = vmatprep.subr.bf16.mxu1 %v3808_v20 }
 0xa74   :  { %v1264_v27 = vadd.f32 %v1260_v23, %v1240_v5  ;;  %v1262_v28 = vmul.f32 %v1258_v24, %v1244_v8  ;;  %v3814_v22 = vld [vmem:[#allocation2 + $0x1bc] ss:$24 sps:$4 sm:$0xff]   ;;  %v3809_v23 = vld [vmem:[#allocation2 + $0x1b0] ss:$24 sps:$4 sm:$0xff]  }
 0xa75   :  { %v1263_v29 = vmul.f32 %v1259_v26, %v1246_v11  ;;  %v1265_v30 = vadd.f32 %v1261_v25, %v1242_v59  ;;  %v3812_v24 = vld [vmem:[#allocation2 + $0x1b8] ss:$24 sps:$4 sm:$0xff]  }
 0xa76   :  { %v1268_v31 = vmul.f32 0.7978846, %v1264_v27  ;;  %v1266_v32 = vadd.f32 %v1262_v28, %v1244_v8 }
 0xa77   :  { %v1267_v33 = vadd.f32 %v1263_v29, %v1246_v11  ;;  %v1269_v34 = vmul.f32 0.7978846, %v1265_v30  ;;  %v3805_v11 = vld [vmem:[#allocation2 + $0x184] ss:$24 sps:$4 sm:$0xff]  }
 0xa78   :  { %3971 = vtanh.f32 %v1268_v31  ;;  %v1270_v37 = vmul.f32 0.7978846, %v1266_v32  ;;  %1820 = vmatprep.subr.bf16.mxu0 %v3805_v11  ;;  %v3817_v31 = vld [vmem:[#allocation2 + $0x1e4] ss:$24 sps:$4 sm:$0xff]   ;;  %v3815_v32 = vld [vmem:[#allocation2 + $0x1e0] ss:$24 sps:$4 sm:$0xff]  }
 0xa79   :  { %v1271_v40 = vmul.f32 0.7978846, %v1267_v33  ;;  %3973 = vtanh.f32 %v1269_v34  ;;  %1821 = vmatpush1.bf16.msra.mxu0 %v3803_v10  ;;  %v3820_v33 = vld [vmem:[#allocation2 + $0x1ec] ss:$24 sps:$4 sm:$0xff]   ;;  %v3818_v34 = vld [vmem:[#allocation2 + $0x1e8] ss:$24 sps:$4 sm:$0xff]  }
 0xa7a   :  { %3975 = vtanh.f32 %v1270_v37  ;;  %1822 = vmatprep.subr.bf16.mxu0 %v3811_v21  ;;  %v3823_v37 = vld [vmem:[#allocation2 + $0x214] ss:$24 sps:$4 sm:$0xff]  }
 0xa7b   :  { %3977 = vtanh.f32 %v1271_v40  ;;  %v3821_v40 = vld [vmem:[#allocation2 + $0x210] ss:$24 sps:$4 sm:$0xff]  }
 0xa7d   :  { %1823 = vmatpush1.bf16.msra.mxu0 %v3809_v23  ;;  %v3851_v23 = vld [vmem:[#allocation2 + $0x190] ss:$24 sps:$4 sm:$0xff]  }
 0xa7e   :  { %1824 = vmatprep.subr.bf16.mxu0 %v3817_v31  ;;  %v3866_v31 = vld [vmem:[#allocation2 + $0x280] ss:$24 sps:$4 sm:$0xff]  }
 0xa81   :  { %1825 = vmatpush1.bf16.msra.mxu0 %v3815_v32  ;;  %v3871_v32 = vld [vmem:[#allocation2 + $0x2b4] ss:$24 sps:$4 sm:$0xff]  }
 0xa82   :  { %v3972_v41 = vpop.eup %3971  ;;  %1826 = vmatprep.subr.bf16.mxu0 %v3823_v37  ;;  %v3872_v37 = vld [vmem:[#allocation2 + $0x2e0] ss:$24 sps:$4 sm:$0xff]  }
 0xa83   :  { %v3974_v38 = vpop.eup %3973  ;;  %v1276_v39 = vadd.f32 1.0, %v3972_v41  ;;  %v3826_v41 = vld [vmem:[#allocation2 + $0x21c] ss:$24 sps:$4 sm:$0xff]  }
 0xa84   :  { %v3976_v44 = vpop.eup %3975  ;;  %v1277_v45 = vadd.f32 1.0, %v3974_v38  ;;  %v3824_v38 = vld [vmem:[#allocation2 + $0x218] ss:$24 sps:$4 sm:$0xff]  }
 0xa85   :  { %v3978_v46 = vpop.eup %3977  ;;  %v1278_v51 = vadd.f32 1.0, %v3976_v44  ;;  %v1280_v55 = vmul.f32 %v1276_v39, %v1248_v47  ;;  %1827 = vmatpush1.bf16.msra.mxu0 %v3821_v40  ;;  %v3829_v39 = vld [vmem:[#allocation2 + $0x244] ss:$24 sps:$4 sm:$0xff]   ;;  %v3827_v44 = vld [vmem:[#allocation2 + $0x240] ss:$24 sps:$4 sm:$0xff]  }
 0xa86   :  { %v1279_v54 = vadd.f32 1.0, %v3978_v46  ;;  %v1281_v57 = vmul.f32 %v1277_v45, %v1249_v52  ;;  %v3832_v45 = vld [vmem:[#allocation2 + $0x24c] ss:$24 sps:$4 sm:$0xff]   ;;  %1828 = vmatprep.subr.bf16.mxu0 %v3829_v39  ;;  %v3830_v46 = vld [vmem:[#allocation2 + $0x248] ss:$24 sps:$4 sm:$0xff]  }
 0xa87   :  { %v1282_v56 = vmul.f32 %v1278_v51, %v1250_v48  ;;  %v3835_v47 = vld [vmem:[#allocation2 + $0x274] ss:$24 sps:$4 sm:$0xff]   ;;  %v3833_v48 = vld [vmem:[#allocation2 + $0x270] ss:$24 sps:$4 sm:$0xff]  }
 0xa88   :  { %v1283_v60 = vmul.f32 %v1279_v54, %v1251_v53  ;;  %v3838_v51 = vld [vmem:[#allocation2 + $0x27c] ss:$24 sps:$4 sm:$0xff]   ;;  %v3836_v52 = vld [vmem:[#allocation2 + $0x278] ss:$24 sps:$4 sm:$0xff]   ;;  %v3220_v40 = vld [vmem:[%s4730_s5 + $0x6] sm:$0x3f] }
 0xa89   :  { %v1316_v61 = vpack.c.bf16 %v1282_v56, %v1280_v55  ;;  %1829 = vmatpush1.bf16.msra.mxu0 %v3827_v44  ;;  %v3841_v53 = vld [vmem:[#allocation2 + $0x2a4] ss:$24 sps:$4 sm:$0xff]   ;;  %v3839_v54 = vld [vmem:[#allocation2 + $0x2a0] ss:$24 sps:$4 sm:$0xff]   ;;  %v1561_v39 = vrot.slane %v3220_v40, %v4348_v18 }
 0xa8a   :  { %v1317_v62 = vpack.c.bf16 %v1283_v60, %v1281_v57  ;;  %1830 = vmatprep.subr.bf16.mxu0 %v3835_v47  ;;  %v3844_v55 = vld [vmem:[#allocation2 + $0x2ac] ss:$24 sps:$4 sm:$0xff]   ;;  %v3842_v56 = vld [vmem:[#allocation2 + $0x2a8] ss:$24 sps:$4 sm:$0xff]  }
 0xa8b   :  { %v3847_v57 = vld [vmem:[#allocation2 + $0x2d4] ss:$24 sps:$4 sm:$0xff]   ;;  %v3845_v60 = vld [vmem:[#allocation2 + $0x2d0] ss:$24 sps:$4 sm:$0xff]  }
 0xa8c   :  { %1450 = vmatprep.mubr.bf16.mxu1 %v1317_v62  ;;  %v3848_v62 = vld [vmem:[#allocation2 + $0x2d8] ss:$24 sps:$4 sm:$0xff]  }
 0xa8d   :  { %1451 = vmatmul.mubr.bf16.vlgmr.msra.gmra.mrb[24].mxu1 %v1316_v61  ;;  %1831 = vmatpush1.bf16.msra.mxu0 %v3833_v48  ;;  %v3850_v61 = vld [vmem:[#allocation2 + $0x2dc] ss:$24 sps:$4 sm:$0xff]  }
 0xa8e   :  { %1895 = vmatprep.mubr.bf16.mxu1 %v4146_v36  ;;  %1864 = vmatpush1.bf16.msra.mxu1 %v3806_v16  ;;  %v1492_v16 = vrot.slane %v4488_v35, %v4376_v50 }
 0xa8f   :  { %1865 = vmatprep.subr.bf16.mxu1 %v3814_v22  ;;  %1832 = vmatprep.subr.bf16.mxu0 %v3841_v53 }
 0xa91   :  { %1833 = vmatpush1.bf16.msra.mxu0 %v3839_v54 }
 0xa92   :  { %1866 = vmatpush1.bf16.msra.mxu1 %v3812_v24  ;;  %1834 = vmatprep.subr.bf16.mxu0 %v3847_v57 }
 0xa93   :  { %1867 = vmatprep.subr.bf16.mxu1 %v3820_v33  ;;  %v3869_v33 = vld [vmem:[#allocation2 + $0x2b0] ss:$24 sps:$4 sm:$0xff]  }
 0xa95   :  { %1835 = vmatpush1.bf16.msra.mxu0 %v3845_v60 }
 0xa96   :  { %1868 = vmatpush1.bf16.msra.mxu1 %v3818_v34  ;;  %v3874_v34 = vld [vmem:[#allocation2 + $0x2e4] ss:$24 sps:$4 sm:$0xff]  }
 0xa97   :  { %1869 = vmatprep.subr.bf16.mxu1 %v3826_v41  ;;  %v1553_v41 = vrot.slane %v3220_v40, %v4339_v15 }
 0xa9a   :  { %1870 = vmatpush1.bf16.msra.mxu1 %v3824_v38  ;;  %v1557_v38 = vrot.slane %v3220_v40, %v4345_v17 }
 0xa9b   :  { %1871 = vmatprep.subr.bf16.mxu1 %v3832_v45 }
 0xa9e   :  { %1872 = vmatpush1.bf16.msra.mxu1 %v3830_v46  ;;  %v1565_v46 = vrot.slane %v3220_v40, %v4351_v19 }
 0xa9f   :  { %1873 = vmatprep.subr.bf16.mxu1 %v3838_v51 }
 0xaa2   :  { %1874 = vmatpush1.bf16.msra.mxu1 %v3836_v52 }
 0xaa3   :  { %1875 = vmatprep.subr.bf16.mxu1 %v3844_v55 }
 0xaa6   :  { %1876 = vmatpush1.bf16.msra.mxu1 %v3842_v56 }
 0xaa7   :  { %1877 = vmatprep.subr.bf16.mxu1 %v3850_v61 }
 0xaaa   :  { %1878 = vmatpush1.bf16.msra.mxu1 %v3848_v62 }
 0xaab   :  { %3551 = vmatprep.subr.bf16.mxu1 %v4147_v12 }
 0xb60   :  { %v3413_v63 = vpop.f32.mrb[24].mxu1 }
 0xb61   :  { %v3414_v2 = vpop.f32.mrb[25].mxu1 }
 0xb62   :  { %v3415_v4 = vadd.f32 %v3414_v2, %v3413_v63  ;;  %v3416_v5 = vpop.f32.mrb[26].mxu1  ;;  %v3853_v63 = vld [vmem:[#allocation2 + $0x194] ss:$24 sps:$4 sm:$0xff]  }
 0xb63   :  { %v3417_v58 = vpop.f32.mrb[27].mxu1  ;;  %1906 = vmatprep.subr.bf16.mxu0 %v3853_v63 }
 0xb64   :  { %v1453_v59 = vadd.f32 %v3415_v4, %v1321_v0  ;;  %v3418_v6 = vadd.f32 %v3417_v58, %v3416_v5 }
 0xb66   :  { %v1456_v7 = vadd.f32 %v3418_v6, %v1321_v0  ;;  %v1459_v8 = vadd.f32 %v1453_v59, %v4498_v42  ;;  %v1486_v6 = vrot.slane %v4488_v35, %v4373_v49  ;;  %v3857_v35 = vld [vmem:[#allocation2 + $0x1f0] ss:$24 sps:$4 sm:$0xff]  }
 0xb68   :  { %1461 = vadd.xlane.f32.xlu0 %v1459_v8  ;;  %v1460_v9 = vadd.f32 %v1456_v7, %v4500_v43 }
 0xb6a   :  { %1463 = vadd.xlane.f32.xlu1 %v1460_v9 }
 0xbf5   :  { %v1462_v42 = vpop.xlane.xlu0 %1461 }
 0xbf6   :  { %v1465_v25 = vmul.f32 0.0078125, %v1462_v42  ;;  %v3856_v42 = vld [vmem:[#allocation2 + $0x1c4] ss:$24 sps:$4 sm:$0xff]  }
 0xbf7   :  { %v1464_v43 = vpop.xlane.xlu1 %1463 }
 0xbf8   :  { %v4515_v26 = vsub.f32 %v1459_v8, %v1465_v25  ;;  %v1466_v27 = vmul.f32 0.0078125, %v1464_v43  ;;  %v3854_v25 = vld [vmem:[#allocation2 + $0x1c0] ss:$24 sps:$4 sm:$0xff]   ;;  %v3859_v43 = vld [vmem:[#allocation2 + $0x1f4] ss:$24 sps:$4 sm:$0xff]  }
 0xbfa   :  { %v4517_v28 = vsub.f32 %v1460_v9, %v1466_v27  ;;  %v1469_v29 = vmul.f32 %v4515_v26, %v4515_v26  ;;  %v3860_v27 = vld [vmem:[#allocation2 + $0x220] ss:$24 sps:$4 sm:$0xff]  }
 0xbfc   :  { %1471 = vadd.xlane.f32.xlu0 %v1469_v29  ;;  %v1470_v30 = vmul.f32 %v4517_v28, %v4517_v28  ;;  %v3863_v29 = vld [vmem:[#allocation2 + $0x250] ss:$24 sps:$4 sm:$0xff]  }
 0xbfe   :  { %1473 = vadd.xlane.f32.xlu1 %v1470_v30  ;;  %v3868_v30 = vld [vmem:[#allocation2 + $0x284] ss:$24 sps:$4 sm:$0xff]  }
 0xc89   :  { %v1472_v0 = vpop.xlane.xlu0 %1471 }
 0xc8a   :  { %v1475_v2 = vmul.f32 0.0078125, %v1472_v0 }
 0xc8b   :  { %v1474_v4 = vpop.xlane.xlu1 %1473 }
 0xc8c   :  { %v1477_v5 = vadd.f32 1e-12, %v1475_v2  ;;  %v1476_v58 = vmul.f32 0.0078125, %v1474_v4 }
 0xc8e   :  { %3979 = vrsqrt.f32 %v1477_v5  ;;  %v1478_v59 = vadd.f32 1e-12, %v1476_v58 }
 0xc90   :  { %3981 = vrsqrt.f32 %v1478_v59 }
 0xc98   :  { %v3980_v7 = vpop.eup %3979 }
 0xc99   :  { %v1481_v8 = vmul.f32 %v3980_v7, %v4515_v26  ;;  %v3862_v26 = vld [vmem:[#allocation2 + $0x224] ss:$24 sps:$4 sm:$0xff]  }
 0xc9a   :  { %v3982_v9 = vpop.eup %3981 }
 0xc9b   :  { %v1482_v10 = vmul.f32 %v3982_v9, %v4517_v28  ;;  %v1487_v11 = vmul.f32 %v1486_v6, %v1481_v8  ;;  %v3865_v28 = vld [vmem:[#allocation2 + $0x254] ss:$24 sps:$4 sm:$0xff]   ;;  %v1569_v9 = vrot.slane %v3220_v40, %v4373_v49 }
 0xc9d   :  { %v1488_v20 = vmul.f32 %v1486_v6, %v1482_v10  ;;  %v4530_v21 = vadd.f32 %v1492_v16, %v1487_v11  ;;  %v1573_v11 = vrot.slane %v3220_v40, %v4376_v50 }
 0xc9f   :  { %v4532_v22 = vadd.f32 %v1492_v16, %v1488_v20 }
 0xca1   :  { %v1546_v24 = vpack.c.bf16 %v4532_v22, %v4530_v21 }
 0xca3   :  { %1853 = vmatmul.mubr.bf16.vlgmr.msra.gmra.mrb[16].mxu0 %v1546_v24  ;;  %1896 = vmatmul.mubr.bf16.vlgmr.msra.gmra.mrb[28].mxu1 %v1546_v24 }
 0xca4   :  { %1907 = vmatpush1.bf16.msra.mxu0 %v3851_v23  ;;  %1938 = vmatprep.mubr.bf16.mxu0 %v4146_v36 }
 0xca5   :  { %1908 = vmatprep.subr.bf16.mxu0 %v3856_v42  ;;  %3553 = vmatprep.mubr.msk.bf16.mxu1 %vm4148_vm0, %v4147_v12 }
 0xca8   :  { %1909 = vmatpush1.bf16.msra.mxu0 %v3854_v25 }
 0xca9   :  { %1910 = vmatprep.subr.bf16.mxu0 %v3859_v43 }
 0xcac   :  { %1911 = vmatpush1.bf16.msra.mxu0 %v3857_v35 }
 0xcad   :  { %1912 = vmatprep.subr.bf16.mxu0 %v3862_v26 }
 0xcb0   :  { %1913 = vmatpush1.bf16.msra.mxu0 %v3860_v27 }
 0xcb1   :  { %1914 = vmatprep.subr.bf16.mxu0 %v3865_v28 }
 0xcb4   :  { %1915 = vmatpush1.bf16.msra.mxu0 %v3863_v29 }
 0xcb5   :  { %1916 = vmatprep.subr.bf16.mxu0 %v3868_v30 }
 0xcb8   :  { %1917 = vmatpush1.bf16.msra.mxu0 %v3866_v31 }
 0xcb9   :  { %1918 = vmatprep.subr.bf16.mxu0 %v3871_v32 }
 0xcbc   :  { %1919 = vmatpush1.bf16.msra.mxu0 %v3869_v33 }
 0xcbd   :  { %1920 = vmatprep.subr.bf16.mxu0 %v3874_v34 }
 0xcc0   :  { %1921 = vmatpush1.bf16.msra.mxu0 %v3872_v37 }
 0xcc1   :  { %3575 = vmatprep.subr.bf16.mxu0 %v4147_v12 }
 0xcc3   :  { %1939 = vmatmul.mubr.bf16.vlgmr.msra.gmra.mrb[20].mxu0 %v1546_v24 }
 0xcc4   :  { %3591 = vmatprep.mubr.msk.bf16.mxu0 %vm4148_vm0, %v4147_v12 }
 0xd76   :  { %v1854_v44 = vpop.f32.mrb[16].mxu0  ;;  %v1897_v45 = vpop.f32.mrb[28].mxu1 }
 0xd77   :  { %v1855_v47 = vadd.f32 %v1854_v44, %v1553_v41  ;;  %v1856_v48 = vpop.f32.mrb[17].mxu0  ;;  %v1899_v51 = vpop.f32.mrb[29].mxu1  ;;  %v1898_v55 = vadd.f32 %v1897_v45, %v1561_v39 }
 0xd78   :  { %v1857_v52 = vadd.f32 %v1856_v48, %v1557_v38  ;;  %v1858_v53 = vpop.f32.mrb[18].mxu0  ;;  %v1901_v54 = vpop.f32.mrb[30].mxu1  ;;  %v4549_v62 = vadd.f32 %v1899_v51, %v1565_v46 }
 0xd79   :  { %v1859_v56 = vadd.f32 %v1858_v53, %v1553_v41  ;;  %v1902_v57 = vadd.f32 %v1901_v54, %v1561_v39  ;;  %v1860_v60 = vpop.f32.mrb[19].mxu0  ;;  %v1903_v61 = vpop.f32.mrb[31].mxu1  ;;  %v1982_v2 = vmul.f32 0.125, %v1855_v47 }
 0xd7a   :  { %v1861_v63 = vadd.f32 %v1860_v60, %v1557_v38  ;;  %v1904_v0 = vadd.f32 %v1903_v61, %v1565_v46  ;;  %v2096_v58 = vmul.f32 0.125, %v1857_v52 }
 0xd7b   :  { %v1983_v4 = vmul.f32 0.125, %v1859_v56  ;;  %v1985_v5 = vpack.c.bf16 %v1902_v57, %v1898_v55 }
 0xd7c   :  { %v2097_v59 = vmul.f32 0.125, %v1861_v63  ;;  %v2099_v6 = vpack.c.bf16 %v1904_v0, %v4549_v62  ;;  %v4017_v0 = vld [vmem:[%s4726_s1] sm:$0xff] }
 0xd7d   :  { %v1984_v7 = vpack.c.bf16 %v1983_v4, %v1982_v2  ;;  %3552 = vmatpush3.bf16.xpose.msra.mxu1 %v1985_v5 }
 0xd7e   :  { %v2098_v8 = vpack.c.bf16 %v2097_v59, %v2096_v58  ;;  %3557 = vmatprep.subr.bf16.mxu1 %v4147_v12  ;;  %v4018_v58 = vld [vmem:[%s4726_s1 + $0x8] sm:$0xff] }
 0xd84   :  { %3554 = vmatmul.mubr.bf16.vlgmr.msra.gmra.mrb[32].mxu1 %v1984_v7 }
 0xd85   :  { %3559 = vmatprep.mubr.msk.bf16.mxu1 %vm4148_vm0, %v4147_v12 }
 0xd96   :  { %v1940_v10 = vpop.f32.mrb[20].mxu0 }
 0xd97   :  { %v1942_v16 = vpop.f32.mrb[21].mxu0  ;;  %v1941_v23 = vadd.f32 %v1940_v10, %v1569_v9 }
 0xd98   :  { %v1944_v20 = vpop.f32.mrb[22].mxu0  ;;  %v1943_v25 = vadd.f32 %v1942_v16, %v1573_v11 }
 0xd99   :  { %v1945_v24 = vadd.f32 %v1944_v20, %v1569_v9  ;;  %v1946_v42 = vpop.f32.mrb[23].mxu0 }
 0xd9a   :  { %v1947_v43 = vadd.f32 %v1946_v42, %v1573_v11 }
 0xd9b   :  { %v1986_v35 = vpack.c.bf16 %v1945_v24, %v1941_v23 }
 0xd9c   :  { %v2100_v26 = vpack.c.bf16 %v1947_v43, %v1943_v25 }
 0xd9d   :  { %3558 = vmatpush3.bf16.msra.mxu1 %v1986_v35  ;;  %v3883_v35 = vld [vmem:[%s4731_s6 + $0xc0] sm:$0xff]  }
 0xd9e   :  { %3563 = vmatprep.subr.bf16.mxu1 %v4147_v12  ;;  %3576 = vmatpush3.bf16.msra.mxu0 %v3883_v35 }
 0xd9f   :  { %3577 = vmatprep.subr.bf16.mxu0 %v4147_v12 }
 0xe57   :  { %v2021_v27 = vpop.f32.mrb[32].mxu1 }
 0xe58   :  { %v2022_v28 = vadd.f32 %v2021_v27, %v4384_v1  ;;  %v3555_v29 = vpop.f32.mrb[33].mxu1  ;;  %v3885_v27 = vld [vmem:[%s4731_s6 + $0xd0] sm:$0xff]  }
 0xe59   :  { %v2024_v30 = vpop.f32.mrb[34].mxu1  ;;  %v3887_v29 = vld [vmem:[%s4731_s6 + $0xe0] sm:$0xff]  }
 0xe5a   :  { %v2025_v31 = vadd.f32 %v2024_v30, %v4389_v3  ;;  %v3556_v32 = vpop.f32.mrb[35].mxu1  ;;  %v2028_v33 = vsel %vm693_vm1, %v2022_v28, -inf  ;;  %v3888_v30 = vld [vmem:[%s4731_s6 + $0xe8] sm:$0xff]  }
 0xe5b   :  { %2029 = vmax.xlane.f32.xlu0 %v2028_v33 }
 0xe5c   :  { %v2031_v34 = vsel %vm693_vm1, %v2025_v31, -inf }
 0xe5d   :  { %2032 = vmax.xlane.f32.xlu1 %v2031_v34 }
 0xee8   :  { %v2030_v37 = vpop.xlane.xlu0 %2029 }
 0xee9   :  { %v2034_v40 = vsub.f32 %v2022_v28, %v2030_v37  ;;  %v3886_v28 = vld [vmem:[%s4731_s6 + $0xd8] sm:$0xff]  }
 0xeea   :  { %v2033_v41 = vpop.xlane.xlu1 %2032 }
 0xeeb   :  { %v2036_v38 = vmul.f32 1.442695, %v2034_v40  ;;  %v2035_v39 = vsub.f32 %v2025_v31, %v2033_v41  ;;  %v3889_v31 = vld [vmem:[%s4731_s6 + $0xf0] sm:$0xff]  }
 0xeed   :  { %3983 = vpow2.f32 %v2036_v38  ;;  %v2038_v44 = vmul.f32 1.442695, %v2035_v39  ;;  %v3875_v38 = vld [vmem:[%s4731_s6 + $0x80] sm:$0xff]  }
 0xeef   :  { %3985 = vpow2.f32 %v2038_v44  ;;  %v3876_v44 = vld [vmem:[%s4731_s6 + $0x88] sm:$0xff]  }
 0xef7   :  { %v3984_v1 = vpop.eup %3983 }
 0xef8   :  { %v2040_v45 = vsel %vm693_vm1, %v3984_v1, 0.0 }
 0xef9   :  { %v3986_v46 = vpop.eup %3985  ;;  %2041 = vadd.xlane.f32.xlu0 %v2040_v45  ;;  %v3878_v45 = vld [vmem:[%s4731_s6 + $0x98] sm:$0xff]  }
 0xefa   :  { %v2043_v3 = vsel %vm693_vm1, %v3986_v46, 0.0 }
 0xefb   :  { %2044 = vadd.xlane.f32.xlu1 %v2043_v3  ;;  %v3880_v3 = vld [vmem:[%s4731_s6 + $0xa8] sm:$0xff]  }
 0xf86   :  { %v2042_v47 = vpop.xlane.xlu0 %2041 }
 0xf87   :  { %3987 = vrcp.f32 %v2042_v47  ;;  %v3881_v47 = vld [vmem:[%s4731_s6 + $0xb0] sm:$0xff]  }
 0xf88   :  { %v2045_v48 = vpop.xlane.xlu1 %2044 }
 0xf89   :  { %3989 = vrcp.f32 %v2045_v48  ;;  %v3882_v48 = vld [vmem:[%s4731_s6 + $0xb8] sm:$0xff]  }
 0xf91   :  { %v3988_v51 = vpop.eup %3987 }
 0xf92   :  { %v2048_v53 = vmul.f32 %v3988_v51, %v3984_v1  ;;  %v3877_v1 = vld [vmem:[%s4731_s6 + $0x90] sm:$0xff]   ;;  %v3890_v51 = vld [vmem:[%s4731_s6 + $0xf8] sm:$0xff]  }
 0xf93   :  { %v3990_v52 = vpop.eup %3989 }
 0xf94   :  { %v2049_v54 = vmul.f32 %v3990_v52, %v3986_v46  ;;  %v3879_v46 = vld [vmem:[%s4731_s6 + $0xa0] sm:$0xff]  }
 0xf96   :  { %v2050_v55 = vpack.c.bf16 %v2049_v54, %v2048_v53 }
 0xf98   :  { %3560 = vmatmul.mubr.msk.bf16.vlgmr.msra.gmra.mrb[36].mxu1 %vm693_vm1, %v2050_v55 }
 0xf99   :  { %3564 = vmatpush3.bf16.xpose.msra.mxu1 %v2099_v6  ;;  %3565 = vmatprep.mubr.msk.bf16.mxu1 %vm4148_vm0, %v4147_v12 }
 0xf9a   :  { %3569 = vmatprep.subr.bf16.mxu1 %v4147_v12 }
 0xfa0   :  { %3566 = vmatmul.mubr.bf16.vlgmr.msra.gmra.mrb[40].mxu1 %v2098_v8 }
 0xfa1   :  { %3570 = vmatpush3.bf16.msra.mxu1 %v2100_v26  ;;  %3571 = vmatprep.mubr.msk.bf16.mxu1 %vm4148_vm0, %v4147_v12  ;;  %v3884_v26 = vld [vmem:[%s4731_s6 + $0xc8] sm:$0xff]  }
 0xfa2   :  { %3595 = vmatprep.subr.bf16.mxu1 %v4147_v12  ;;  %3578 = vmatpush3.bf16.msra.mxu0 %v3884_v26 }
 0xfa3   :  { %3579 = vmatprep.subr.bf16.mxu0 %v4147_v12 }
 0xfa6   :  { %3580 = vmatpush3.bf16.msra.mxu0 %v3885_v27  ;;  %v3897_v27 = vld [vmem:[#allocation4 + $0xa0] ss:$8 sps:$4 sm:$0xff]  }
 0xfa7   :  { %3581 = vmatprep.subr.bf16.mxu0 %v4147_v12 }
 0xfaa   :  { %3582 = vmatpush3.bf16.msra.mxu0 %v3886_v28  ;;  %v3902_v28 = vld [vmem:[#allocation4 + $0xb4] ss:$8 sps:$4 sm:$0xff]  }
 0xfab   :  { %3583 = vmatprep.subr.bf16.mxu0 %v4147_v12 }
 0xfae   :  { %3584 = vmatpush3.bf16.msra.mxu0 %v3887_v29  ;;  %v3900_v29 = vld [vmem:[#allocation4 + $0xb0] ss:$8 sps:$4 sm:$0xff]  }
 0xfaf   :  { %3585 = vmatprep.subr.bf16.mxu0 %v4147_v12 }
 0xfb2   :  { %3586 = vmatpush3.bf16.msra.mxu0 %v3888_v30  ;;  %v3905_v30 = vld [vmem:[#allocation4 + $0xc4] ss:$8 sps:$4 sm:$0xff]  }
 0xfb3   :  { %3587 = vmatprep.subr.bf16.mxu0 %v4147_v12 }
 0xfb6   :  { %3588 = vmatpush3.bf16.msra.mxu0 %v3889_v31  ;;  %v3903_v31 = vld [vmem:[#allocation4 + $0xc0] ss:$8 sps:$4 sm:$0xff]  }
 0xfb7   :  { %3589 = vmatprep.subr.bf16.mxu0 %v4147_v12 }
 0xfba   :  { %3590 = vmatpush3.bf16.msra.mxu0 %v3890_v51 }
0x106b   :  { %v4571_v56 = vpop.f32.mrb[36].mxu1 }
0x106c   :  { %v3561_v57 = vpop.f32.mrb[37].mxu1 }
0x106d   :  { %v4573_v60 = vpop.f32.mrb[38].mxu1 }
0x106e   :  { %v2095_v61 = vpack.c.bf16 %v4573_v60, %v4571_v56  ;;  %v3562_v62 = vpop.f32.mrb[39].mxu1  ;;  %v4659_v56 = vld [vmem:[%s4735_s10 + $0x8] sm:$0xff] }
0x106f   :  { %v2391_v60 = vrot.slane %v4659_v56, %v4339_v15 }
0x1073   :  { %v2135_v63 = vpop.f32.mrb[40].mxu1 }
0x1074   :  { %v2136_v2 = vadd.f32 %v4017_v0, %v2135_v63  ;;  %v3567_v4 = vpop.f32.mrb[41].mxu1 }
0x1075   :  { %v2138_v5 = vpop.f32.mrb[42].mxu1 }
0x1076   :  { %v2139_v59 = vadd.f32 %v4018_v58, %v2138_v5  ;;  %v3568_v6 = vpop.f32.mrb[43].mxu1  ;;  %v2142_v7 = vsel %vm693_vm1, %v2136_v2, -inf }
0x1077   :  { %2143 = vmax.xlane.f32.xlu0 %v2142_v7 }
0x1078   :  { %v2145_v8 = vsel %vm693_vm1, %v2139_v59, -inf }
0x1079   :  { %2146 = vmax.xlane.f32.xlu1 %v2145_v8 }
0x1104   :  { %v2144_v9 = vpop.xlane.xlu0 %2143 }
0x1105   :  { %v2148_v10 = vsub.f32 %v2136_v2, %v2144_v9 }
0x1106   :  { %v2147_v11 = vpop.xlane.xlu1 %2146 }
0x1107   :  { %v2150_v16 = vmul.f32 1.442695, %v2148_v10  ;;  %v2149_v20 = vsub.f32 %v2139_v59, %v2147_v11  ;;  %v3891_v10 = vld [vmem:[#allocation4 + $0x80] ss:$8 sps:$4 sm:$0xff]   ;;  %v3893_v11 = vld [vmem:[#allocation4 + $0x84] ss:$8 sps:$4 sm:$0xff]  }
0x1108   :  { %2541 = vmatprep.subr.bf16.mxu0 %v3893_v11  ;;  %v3930_v11 = vld [vmem:[#allocation6 + $0xb8] sm:$0xff]  }
0x1109   :  { %3991 = vpow2.f32 %v2150_v16  ;;  %v2152_v23 = vmul.f32 1.442695, %v2149_v20  ;;  %v3896_v16 = vld [vmem:[#allocation4 + $0x94] ss:$8 sps:$4 sm:$0xff]   ;;  %v3894_v20 = vld [vmem:[#allocation4 + $0x90] ss:$8 sps:$4 sm:$0xff]  }
0x110b   :  { %3993 = vpow2.f32 %v2152_v23 }
0x1113   :  { %v3992_v24 = vpop.eup %3991 }
0x1114   :  { %v2154_v42 = vsel %vm693_vm1, %v3992_v24, 0.0 }
0x1115   :  { %v3994_v25 = vpop.eup %3993  ;;  %2155 = vadd.xlane.f32.xlu0 %v2154_v42 }
0x1116   :  { %v2157_v43 = vsel %vm693_vm1, %v3994_v25, 0.0 }
0x1117   :  { %2158 = vadd.xlane.f32.xlu1 %v2157_v43 }
0x11a2   :  { %v2156_v32 = vpop.xlane.xlu0 %2155 }
0x11a3   :  { %3995 = vrcp.f32 %v2156_v32  ;;  %v3908_v32 = vld [vmem:[#allocation4 + $0xd4] ss:$8 sps:$4 sm:$0xff]  }
0x11a4   :  { %v2159_v33 = vpop.xlane.xlu1 %2158 }
0x11a5   :  { %3997 = vrcp.f32 %v2159_v33  ;;  %v3906_v33 = vld [vmem:[#allocation4 + $0xd0] ss:$8 sps:$4 sm:$0xff]  }
0x11ad   :  { %v3996_v34 = vpop.eup %3995 }
0x11ae   :  { %v2162_v40 = vmul.f32 %v3996_v34, %v3992_v24  ;;  %v3911_v34 = vld [vmem:[#allocation4 + $0xe4] ss:$8 sps:$4 sm:$0xff]  }
0x11af   :  { %v3998_v37 = vpop.eup %3997 }
0x11b0   :  { %v2163_v41 = vmul.f32 %v3998_v37, %v3994_v25  ;;  %v3909_v37 = vld [vmem:[#allocation4 + $0xe0] ss:$8 sps:$4 sm:$0xff]  }
0x11b2   :  { %v2164_v39 = vpack.c.bf16 %v2163_v41, %v2162_v40  ;;  %v3914_v40 = vld [vmem:[#allocation4 + $0xf4] ss:$8 sps:$4 sm:$0xff]   ;;  %v3912_v41 = vld [vmem:[#allocation4 + $0xf0] ss:$8 sps:$4 sm:$0xff]  }
0x11b4   :  { %3572 = vmatmul.mubr.msk.bf16.vlgmr.msra.gmra.mrb[44].mxu1 %vm693_vm1, %v2164_v39 }
0x11b5   :  { %3596 = vmatpush3.bf16.msra.mxu1 %v3875_v38  ;;  %3611 = vmatprep.mubr.msk.bf16.mxu1 %vm4148_vm0, %v4147_v12 }
0x11b6   :  { %3597 = vmatprep.subr.bf16.mxu1 %v4147_v12 }
0x11b9   :  { %3598 = vmatpush3.bf16.msra.mxu1 %v3876_v44 }
0x11ba   :  { %3599 = vmatprep.subr.bf16.mxu1 %v4147_v12 }
0x11bd   :  { %3600 = vmatpush3.bf16.msra.mxu1 %v3877_v1 }
0x11be   :  { %3601 = vmatprep.subr.bf16.mxu1 %v4147_v12 }
0x11c1   :  { %3602 = vmatpush3.bf16.msra.mxu1 %v3878_v45 }
0x11c2   :  { %3603 = vmatprep.subr.bf16.mxu1 %v4147_v12 }
0x11c5   :  { %3604 = vmatpush3.bf16.msra.mxu1 %v3879_v46 }
0x11c6   :  { %3605 = vmatprep.subr.bf16.mxu1 %v4147_v12 }
0x11c9   :  { %3606 = vmatpush3.bf16.msra.mxu1 %v3880_v3  ;;  %v2421_v3 = vrot.slane %v4659_v56, %v4345_v17 }
0x11ca   :  { %3607 = vmatprep.subr.bf16.mxu1 %v4147_v12 }
0x11cd   :  { %3608 = vmatpush3.bf16.msra.mxu1 %v3881_v47 }
0x11ce   :  { %3609 = vmatprep.subr.bf16.mxu1 %v4147_v12 }
0x11d1   :  { %3610 = vmatpush3.bf16.msra.mxu1 %v3882_v48 }
0x11d4   :  { %3612 = vmatmul.mubr.bf16.vlgmr.msra.gmra.mrb[48].mxu1 %v2095_v61 }
0x1287   :  { %v2202_v52 = vpop.f32.mrb[44].mxu1 }
0x1288   :  { %v3573_v53 = vpop.f32.mrb[45].mxu1 }
0x1289   :  { %v2205_v54 = vpop.f32.mrb[46].mxu1 }
0x128a   :  { %v2209_v55 = vpack.c.bf16 %v2205_v54, %v2202_v52  ;;  %v3574_v57 = vpop.f32.mrb[47].mxu1  ;;  %v2427_v54 = vrot.slane %v4659_v56, %v4348_v18  ;;  %v3919_v18 = vld [vmem:[#allocation6 + $0xd0] sm:$0xff]  }
0x128c   :  { %3592 = vmatmul.mubr.bf16.vlgmr.msra.gmra.mrb[24].mxu0 %v2209_v55 }
0x128d   :  { %2573 = vmatprep.mubr.bf16.mxu0 %v4146_v36  ;;  %2542 = vmatpush1.bf16.msra.mxu0 %v3891_v10  ;;  %v3929_v10 = vld [vmem:[#allocation6 + $0xf8] sm:$0xff]  }
0x128e   :  { %2543 = vmatprep.subr.bf16.mxu0 %v3896_v16  ;;  %v3319_v16 = vld [vmem:[%s4733_s8 + $0x2] sm:$0x3] }
0x1291   :  { %2544 = vmatpush1.bf16.msra.mxu0 %v3894_v20  ;;  %v2454_v20 = vrot.slane %v3319_v16, %v4339_v15 }
0x12a7   :  { %v2381_v62 = vpop.f32.mrb[48].mxu1 }
0x12a8   :  { %v3613_v63 = vpop.f32.mrb[49].mxu1 }
0x12a9   :  { %v2384_v0 = vpop.f32.mrb[50].mxu1 }
0x12aa   :  { %v3614_v2 = vpop.f32.mrb[51].mxu1 }
0x12ab   :  { %v3916_v2 = vld [vmem:[#allocation6 + $0x80] sm:$0xff]  }
0x135f   :  { %v2292_v61 = vpop.f32.mrb[24].mxu0 }
0x1360   :  { %v2382_v4 = vadd.f32 %v2381_v62, %v2292_v61  ;;  %v3593_v5 = vpop.f32.mrb[25].mxu0  ;;  %v3918_v61 = vld [vmem:[#allocation6 + $0x88] sm:$0xff]  }
0x1361   :  { %v2295_v58 = vpop.f32.mrb[26].mxu0  ;;  %v3921_v5 = vld [vmem:[#allocation6 + $0xd8] sm:$0xff]  }
0x1362   :  { %v2392_v59 = vadd.f32 %v2391_v60, %v2382_v4  ;;  %v2385_v6 = vadd.f32 %v2384_v0, %v2295_v58  ;;  %v3594_v7 = vpop.f32.mrb[27].mxu0  ;;  %v3915_v0 = vld [vmem:[#allocation6 + $0xc0] sm:$0xff]   ;;  %v3920_v4 = vld [vmem:[#allocation6 + $0x90] sm:$0xff]   ;;  %v3922_v58 = vld [vmem:[#allocation6 + $0x98] sm:$0xff]  }
0x1363   :  { %3445 = vmatprep.subr.bf16.mxu1 %v3915_v0  ;;  %v3925_v7 = vld [vmem:[#allocation6 + $0xe8] sm:$0xff]  }
0x1364   :  { %v2393_v36 = vadd.f32 %v2391_v60, %v2385_v6  ;;  %v2394_v8 = vadd.f32 %v2392_v59, %v4530_v21  ;;  %3446 = vmatpush3.bf16.msra.mxu1 %v3916_v2  ;;  %v3917_v60 = vld [vmem:[#allocation6 + $0xc8] sm:$0xff]   ;;  %v3923_v59 = vld [vmem:[#allocation6 + $0xe0] sm:$0xff]  }
0x1365   :  { %3447 = vmatprep.subr.bf16.mxu1 %v3917_v60  ;;  %v3924_v6 = vld [vmem:[#allocation6 + $0xa0] sm:$0xff]  }
0x1366   :  { %2396 = vadd.xlane.f32.xlu0 %v2394_v8  ;;  %v2395_v9 = vadd.f32 %v2393_v36, %v4532_v22  ;;  %v3899_v22 = vld [vmem:[#allocation4 + $0xa4] ss:$8 sps:$4 sm:$0xff]  }
0x1367   :  { %2545 = vmatprep.subr.bf16.mxu0 %v3899_v22  ;;  %v3926_v36 = vld [vmem:[#allocation6 + $0xa8] sm:$0xff]  }
0x1368   :  { %2398 = vadd.xlane.f32.xlu1 %v2395_v9  ;;  %2546 = vmatpush1.bf16.msra.mxu0 %v3897_v27 }
0x1369   :  { %2547 = vmatprep.subr.bf16.mxu0 %v3902_v28  ;;  %3448 = vmatpush3.bf16.msra.mxu1 %v3918_v61 }
0x136a   :  { %3449 = vmatprep.subr.bf16.mxu1 %v3919_v18 }
0x136c   :  { %2548 = vmatpush1.bf16.msra.mxu0 %v3900_v29 }
0x136d   :  { %2549 = vmatprep.subr.bf16.mxu0 %v3905_v30  ;;  %3450 = vmatpush3.bf16.msra.mxu1 %v3920_v4 }
0x136e   :  { %3451 = vmatprep.subr.bf16.mxu1 %v3921_v5 }
0x1370   :  { %2550 = vmatpush1.bf16.msra.mxu0 %v3903_v31 }
0x1371   :  { %2551 = vmatprep.subr.bf16.mxu0 %v3908_v32  ;;  %3452 = vmatpush3.bf16.msra.mxu1 %v3922_v58 }
0x1372   :  { %3453 = vmatprep.subr.bf16.mxu1 %v3923_v59 }
0x1374   :  { %2552 = vmatpush1.bf16.msra.mxu0 %v3906_v33 }
0x1375   :  { %2553 = vmatprep.subr.bf16.mxu0 %v3911_v34  ;;  %3454 = vmatpush3.bf16.msra.mxu1 %v3924_v6 }
0x1376   :  { %3455 = vmatprep.subr.bf16.mxu1 %v3925_v7 }
0x1378   :  { %2554 = vmatpush1.bf16.msra.mxu0 %v3909_v37 }
0x1379   :  { %2555 = vmatprep.subr.bf16.mxu0 %v3914_v40  ;;  %3456 = vmatpush3.bf16.msra.mxu1 %v3926_v36  ;;  %v2658_v36 = vrot.slane %v4659_v56, %v4351_v19 }
0x137c   :  { %2556 = vmatpush1.bf16.msra.mxu0 %v3912_v41 }
0x137d   :  { %3615 = vmatprep.subr.bf16.mxu0 %v4147_v12 }
0x13f3   :  { %v2397_v23 = vpop.xlane.xlu0 %2396 }
0x13f4   :  { %v2400_v24 = vmul.f32 0.0078125, %v2397_v23  ;;  %v2458_v23 = vrot.slane %v3319_v16, %v4345_v17 }
0x13f5   :  { %v2399_v42 = vpop.xlane.xlu1 %2398 }
0x13f6   :  { %v2402_v25 = vsub.f32 %v2394_v8, %v2400_v24  ;;  %v2401_v43 = vmul.f32 0.0078125, %v2399_v42  ;;  %v3927_v8 = vld [vmem:[#allocation6 + $0xf0] sm:$0xff]  }
0x13f7   :  { %3457 = vmatprep.subr.bf16.mxu1 %v3927_v8 }
0x13f8   :  { %v2403_v35 = vsub.f32 %v2395_v9, %v2401_v43  ;;  %v2404_v26 = vmul.f32 %v2402_v25, %v2402_v25  ;;  %v3928_v9 = vld [vmem:[#allocation6 + $0xb0] sm:$0xff]  }
0x13f9   :  { %3458 = vmatpush3.bf16.msra.mxu1 %v3928_v9 }
0x13fa   :  { %2406 = vadd.xlane.f32.xlu0 %v2404_v26  ;;  %v2405_v21 = vmul.f32 %v2403_v35, %v2403_v35  ;;  %3459 = vmatprep.subr.bf16.mxu1 %v3929_v10 }
0x13fc   :  { %2408 = vadd.xlane.f32.xlu1 %v2405_v21 }
0x13fd   :  { %3460 = vmatpush3.bf16.msra.mxu1 %v3930_v11 }
0x13fe   :  { %3621 = vmatprep.subr.bf16.mxu1 %v4147_v12 }
0x1487   :  { %v2407_v38 = vpop.xlane.xlu0 %2406 }
0x1488   :  { %v2410_v39 = vmul.f32 0.0078125, %v2407_v38 }
0x1489   :  { %v2409_v44 = vpop.xlane.xlu1 %2408 }
0x148a   :  { %v2412_v1 = vadd.f32 1e-12, %v2410_v39  ;;  %v2411_v45 = vmul.f32 0.0078125, %v2409_v44 }
0x148c   :  { %3999 = vrsqrt.f32 %v2412_v1  ;;  %v2413_v46 = vadd.f32 1e-12, %v2411_v45 }
0x148e   :  { %4001 = vrsqrt.f32 %v2413_v46 }
0x1496   :  { %v4000_v47 = vpop.eup %3999 }
0x1497   :  { %v2416_v48 = vmul.f32 %v4000_v47, %v2402_v25 }
0x1498   :  { %v4002_v51 = vpop.eup %4001 }
0x1499   :  { %v2417_v52 = vmul.f32 %v4002_v51, %v2403_v35  ;;  %v2422_v53 = vmul.f32 %v2421_v3, %v2416_v48 }
0x149b   :  { %v2423_v55 = vmul.f32 %v2421_v3, %v2417_v52  ;;  %v4670_v57 = vadd.f32 %v2427_v54, %v2422_v53 }
0x149d   :  { %v4672_v62 = vadd.f32 %v2427_v54, %v2423_v55 }
0x149f   :  { %v2447_v63 = vpack.c.bf16 %v4672_v62, %v4670_v57 }
0x14a1   :  { %2574 = vmatmul.mubr.bf16.vlgmr.msra.gmra.mrb[28].mxu0 %v2447_v63 }
0x14a2   :  { %3617 = vmatprep.mubr.msk.bf16.mxu0 %vm4148_vm0, %v4147_v12 }
0x1574   :  { %v2575_v24 = vpop.f32.mrb[28].mxu0 }
0x1575   :  { %v2576_v42 = vadd.f32 %v2575_v24, %v2454_v20  ;;  %v2577_v25 = vpop.f32.mrb[29].mxu0 }
0x1576   :  { %v2578_v43 = vadd.f32 %v2577_v25, %v2458_v23  ;;  %v2579_v35 = vpop.f32.mrb[30].mxu0 }
0x1577   :  { %v2588_v26 = vmul.f32 0.044715, %v2576_v42  ;;  %v2580_v21 = vadd.f32 %v2579_v35, %v2454_v20  ;;  %v2581_v22 = vpop.f32.mrb[31].mxu0  ;;  %v2584_v55 = vmul.f32 0.5, %v2576_v42 }
0x1578   :  { %v2589_v27 = vmul.f32 0.044715, %v2578_v43  ;;  %v2582_v28 = vadd.f32 %v2581_v22, %v2458_v23  ;;  %v2585_v2 = vmul.f32 0.5, %v2578_v43 }
0x1579   :  { %v2592_v29 = vmul.f32 %v2588_v26, %v2576_v42  ;;  %v2590_v30 = vmul.f32 0.044715, %v2580_v21  ;;  %v2586_v63 = vmul.f32 0.5, %v2580_v21 }
0x157a   :  { %v2593_v31 = vmul.f32 %v2589_v27, %v2578_v43  ;;  %v2591_v32 = vmul.f32 0.044715, %v2582_v28  ;;  %v2587_v60 = vmul.f32 0.5, %v2582_v28 }
0x157b   :  { %v2596_v33 = vmul.f32 %v2592_v29, %v2576_v42  ;;  %v2594_v34 = vmul.f32 %v2590_v30, %v2580_v21  ;;  %v3932_v29 = vld [vmem:[#allocation7 + $0x8] sm:$0xff]   ;;  %v3935_v30 = vld [vmem:[#allocation7 + $0x20] sm:$0xff]  }
0x157c   :  { %v2597_v37 = vmul.f32 %v2593_v31, %v2578_v43  ;;  %v2595_v15 = vmul.f32 %v2591_v32, %v2582_v28  ;;  %v3936_v31 = vld [vmem:[#allocation7 + $0x28] sm:$0xff]   ;;  %v3937_v32 = vld [vmem:[#allocation7 + $0x30] sm:$0xff]  }
0x157d   :  { %v2600_v40 = vadd.f32 %v2596_v33, %v2576_v42  ;;  %v2598_v17 = vmul.f32 %v2594_v34, %v2580_v21 }
0x157e   :  { %v2599_v41 = vmul.f32 %v2595_v15, %v2582_v28  ;;  %v2601_v38 = vadd.f32 %v2597_v37, %v2578_v43 }
0x157f   :  { %v2604_v39 = vmul.f32 0.7978846, %v2600_v40  ;;  %v2602_v44 = vadd.f32 %v2598_v17, %v2580_v21 }
0x1580   :  { %v2603_v1 = vadd.f32 %v2599_v41, %v2582_v28  ;;  %v2605_v45 = vmul.f32 0.7978846, %v2601_v38  ;;  %v3931_v28 = vld [vmem:[#allocation7] sm:$0xff]   ;;  %v2835_v41 = vand.u32 127, %v216_v13  ;;  %v2836_v38 = vmul.u32 8, %v4336_v14  ;;  %v3938_v14 = vld [vmem:[#allocation7 + $0x38] sm:$0xff]  }
0x1581   :  { %4003 = vtanh.f32 %v2604_v39  ;;  %v2606_v46 = vmul.f32 0.7978846, %v2602_v44  ;;  %v2823_v39 = vrot.slane %v4659_v56, %v4373_v49  ;;  %v3939_v49 = vld [vmem:[#allocation9] sm:$0xff]  }
0x1582   :  { %v2607_v3 = vmul.f32 0.7978846, %v2603_v1  ;;  %4005 = vtanh.f32 %v2605_v45  ;;  %vm2837_vm2 = vcmp.eq.s32.totalorder %v2835_v41, %v2836_v38 }
0x1583   :  { %4007 = vtanh.f32 %v2606_v46  ;;  %vm2839_vm4 = vmand %vm2837_vm2, %vm2838_vm3 }
0x1584   :  { %4009 = vtanh.f32 %v2607_v3 }
0x158b   :  { %v4004_v47 = vpop.eup %4003 }
0x158c   :  { %v4006_v48 = vpop.eup %4005  ;;  %v2612_v51 = vadd.f32 1.0, %v4004_v47  ;;  %v2829_v47 = vrot.slane %v4659_v56, %v4376_v50  ;;  %v3940_v50 = vld [vmem:[#allocation9 + $0x8] sm:$0xff]   ;;  %v3941_v56 = vld [vmem:[#allocation9 + $0x10] sm:$0xff]  }
0x158d   :  { %v4008_v52 = vpop.eup %4007  ;;  %v2613_v53 = vadd.f32 1.0, %v4006_v48 }
0x158e   :  { %v4010_v54 = vpop.eup %4009  ;;  %v2614_v0 = vadd.f32 1.0, %v4008_v52  ;;  %v2616_v18 = vmul.f32 %v2612_v51, %v2584_v55  ;;  %v2840_v52 = vsel %vm2839_vm4, 1.0, %v4147_v12  ;;  %v3942_v55 = vld [vmem:[#allocation9 + $0x18] sm:$0xff]  }
0x158f   :  { %v2615_v61 = vadd.f32 1.0, %v4010_v54  ;;  %v2617_v5 = vmul.f32 %v2613_v53, %v2585_v2  ;;  %v2841_v54 = vpack.c.bf16 %v2840_v52, %v2840_v52 }
0x1590   :  { %v2618_v4 = vmul.f32 %v2614_v0, %v2586_v63 }
0x1591   :  { %v2619_v58 = vmul.f32 %v2615_v61, %v2587_v60 }
0x1592   :  { %v2653_v59 = vpack.c.bf16 %v2618_v4, %v2616_v18  ;;  %v3943_v18 = vld [vmem:[#allocation9 + $0x20] sm:$0xff]   ;;  %v3944_v4 = vld [vmem:[#allocation9 + $0x28] sm:$0xff]  }
0x1593   :  { %v2654_v6 = vpack.c.bf16 %v2619_v58, %v2617_v5  ;;  %v3945_v5 = vld [vmem:[#allocation9 + $0x30] sm:$0xff]   ;;  %v3946_v58 = vld [vmem:[#allocation9 + $0x38] sm:$0xff]  }
0x1595   :  { %2787 = vmatprep.mubr.bf16.mxu1 %v2654_v6 }
0x1596   :  { %2788 = vmatmul.mubr.bf16.vlgmr.msra.gmra.mrb[52].mxu1 %v2653_v59  ;;  %v3353_v59 = vld [vmem:[%s4737_s12] ss:$0 sm:$0xff]  ;;  %s4742_s12 = sld [smem:[#allocation13_spill]] }
0x1597   :  { %3637 = vmatprep.mubr.msk.bf16.mxu1 %vm4148_vm0, %v4147_v12  ;;  %3622 = vmatpush3.bf16.msra.mxu1 %v3931_v28 }
0x1598   :  { %3623 = vmatprep.subr.bf16.mxu1 %v4147_v12 }
0x159b   :  { %3624 = vmatpush3.bf16.msra.mxu1 %v3932_v29 }
0x159c   :  { %3625 = vmatprep.subr.bf16.mxu1 %v4147_v12 }
0x1669   :  { %v3461_v7 = vpop.f32.mrb[52].mxu1 }
0x166a   :  { %v3462_v8 = vpop.f32.mrb[53].mxu1 }
0x166b   :  { %v3463_v9 = vadd.f32 %v3462_v8, %v3461_v7  ;;  %v3464_v10 = vpop.f32.mrb[54].mxu1 }
0x166c   :  { %v3465_v11 = vpop.f32.mrb[55].mxu1 }
0x166d   :  { %v2790_v16 = vadd.f32 %v3463_v9, %v2658_v36  ;;  %v3466_v20 = vadd.f32 %v3465_v11, %v3464_v10 }
0x166f   :  { %v2793_v23 = vadd.f32 %v3466_v20, %v2658_v36  ;;  %v2796_v24 = vadd.f32 %v2790_v16, %v4670_v57  ;;  %v3933_v57 = vld [vmem:[#allocation7 + $0x10] sm:$0xff]   ;;  %v3362_v16 = vld [vmem:[%s4739_s14] ss:$0 sm:$0xff] }
0x1670   :  { %3626 = vmatpush3.bf16.msra.mxu1 %v3933_v57 }
0x1671   :  { %2798 = vadd.xlane.f32.xlu0 %v2796_v24  ;;  %v2797_v42 = vadd.f32 %v2793_v23, %v4672_v62  ;;  %v3934_v62 = vld [vmem:[#allocation7 + $0x18] sm:$0xff]   ;;  %3627 = vmatprep.subr.bf16.mxu1 %v4147_v12 }
0x1673   :  { %2800 = vadd.xlane.f32.xlu1 %v2797_v42 }
0x1674   :  { %3628 = vmatpush3.bf16.msra.mxu1 %v3934_v62 }
0x1675   :  { %3629 = vmatprep.subr.bf16.mxu1 %v4147_v12 }
0x1678   :  { %3630 = vmatpush3.bf16.msra.mxu1 %v3935_v30 }
0x1679   :  { %3631 = vmatprep.subr.bf16.mxu1 %v4147_v12 }
0x167c   :  { %3632 = vmatpush3.bf16.msra.mxu1 %v3936_v31 }
0x167d   :  { %3633 = vmatprep.subr.bf16.mxu1 %v4147_v12 }
0x1680   :  { %3634 = vmatpush3.bf16.msra.mxu1 %v3937_v32 }
0x1681   :  { %3635 = vmatprep.subr.bf16.mxu1 %v4147_v12 }
0x1684   :  { %3636 = vmatpush3.bf16.msra.mxu1 %v3938_v14 }
0x16fe   :  { %v2799_v25 = vpop.xlane.xlu0 %2798 }
0x16ff   :  { %v2802_v43 = vmul.f32 0.0078125, %v2799_v25 }
0x1700   :  { %v2801_v35 = vpop.xlane.xlu1 %2800 }
0x1701   :  { %v2804_v26 = vsub.f32 %v2796_v24, %v2802_v43  ;;  %v2803_v21 = vmul.f32 0.0078125, %v2801_v35 }
0x1703   :  { %v2805_v22 = vsub.f32 %v2797_v42, %v2803_v21  ;;  %v2806_v19 = vmul.f32 %v2804_v26, %v2804_v26 }
0x1705   :  { %2808 = vadd.xlane.f32.xlu0 %v2806_v19  ;;  %v2807_v27 = vmul.f32 %v2805_v22, %v2805_v22 }
0x1707   :  { %2810 = vadd.xlane.f32.xlu1 %v2807_v27 }
0x1792   :  { %v2809_v33 = vpop.xlane.xlu0 %2808 }
0x1793   :  { %v2812_v34 = vmul.f32 0.0078125, %v2809_v33 }
0x1794   :  { %v2811_v37 = vpop.xlane.xlu1 %2810 }
0x1795   :  { %v2814_v15 = vadd.f32 1e-12, %v2812_v34  ;;  %v2813_v40 = vmul.f32 0.0078125, %v2811_v37 }
0x1797   :  { %4011 = vrsqrt.f32 %v2814_v15  ;;  %v2815_v17 = vadd.f32 1e-12, %v2813_v40 }
0x1799   :  { %4013 = vrsqrt.f32 %v2815_v17 }
0x17a1   :  { %v4012_v44 = vpop.eup %4011 }
0x17a2   :  { %v2818_v1 = vmul.f32 %v4012_v44, %v2804_v26 }
0x17a3   :  { %v4014_v45 = vpop.eup %4013 }
0x17a4   :  { %v2819_v46 = vmul.f32 %v4014_v45, %v2805_v22  ;;  %v2824_v3 = vmul.f32 %v2823_v39, %v2818_v1 }
0x17a6   :  { %v2825_v48 = vmul.f32 %v2823_v39, %v2819_v46  ;;  %v2830_v51 = vadd.f32 %v2829_v47, %v2824_v3 }
0x17a8   :  { %v2831_v13 = vadd.f32 %v2829_v47, %v2825_v48 }
0x17aa   :  { %v2842_v53 = vpack.c.bf16 %v2831_v13, %v2830_v51 }
0x17ac   :  { %3616 = vmatpush3.bf16.msra.mxu0 %v2842_v53 }
0x17ad   :  { %3641 = vmatprep.subr.bf16.mxu0 %v4147_v12 }
0x17af   :  { %3618 = vmatmul.mubr.msk.bf16.vlgmr.msra.gmra.mrb[32].mxu0 %vm693_vm1, %v2841_v54 }
0x17b0   :  { %3657 = vmatprep.mubr.msk.bf16.mxu0 %vm4148_vm0, %v4147_v12  ;;  %3642 = vmatpush3.bf16.msra.mxu0 %v3939_v49 }
0x17b1   :  { %3643 = vmatprep.subr.bf16.mxu0 %v4147_v12 }
0x17b4   :  { %3644 = vmatpush3.bf16.msra.mxu0 %v3940_v50 }
0x17b5   :  { %3645 = vmatprep.subr.bf16.mxu0 %v4147_v12 }
0x17b8   :  { %3646 = vmatpush3.bf16.msra.mxu0 %v3941_v56 }
0x17b9   :  { %3647 = vmatprep.subr.bf16.mxu0 %v4147_v12 }
0x17bc   :  { %3648 = vmatpush3.bf16.msra.mxu0 %v3942_v55 }
0x17bd   :  { %3649 = vmatprep.subr.bf16.mxu0 %v4147_v12 }
0x17c0   :  { %3650 = vmatpush3.bf16.msra.mxu0 %v3943_v18 }
0x17c1   :  { %3651 = vmatprep.subr.bf16.mxu0 %v4147_v12 }
0x17c4   :  { %3652 = vmatpush3.bf16.msra.mxu0 %v3944_v4 }
0x17c5   :  { %3653 = vmatprep.subr.bf16.mxu0 %v4147_v12 }
0x17c8   :  { %3654 = vmatpush3.bf16.msra.mxu0 %v3945_v5 }
0x17c9   :  { %3655 = vmatprep.subr.bf16.mxu0 %v4147_v12 }
0x17cc   :  { %3656 = vmatpush3.bf16.msra.mxu0 %v3946_v58 }
0x1882   :  { %v2880_v63 = vpop.f32.mrb[32].mxu0 }
0x1883   :  { %v2902_v0 = vpack.c.bf16 %v2880_v63, %v2880_v63  ;;  %v3619_v2 = vpop.f32.mrb[33].mxu0 }
0x1884   :  { %v2883_v60 = vpop.f32.mrb[34].mxu0 }
0x1885   :  { %v3620_v61 = vpop.f32.mrb[35].mxu0  ;;  %3638 = vmatmul.mubr.bf16.vlgmr.msra.gmra.mrb[56].mxu1 %v2902_v0 }
0x1958   :  { %v2992_v6 = vpop.f32.mrb[56].mxu1 }
0x1959   :  { %v2993_v7 = vadd.f32 %v3353_v59, %v2992_v6  ;;  %v3639_v36 = vpop.f32.mrb[57].mxu1 }
0x195a   :  { %v2995_v8 = vpop.f32.mrb[58].mxu1 }
0x195b   :  { %4015 = vtanh.f32 %v2993_v7  ;;  %v3640_v9 = vpop.f32.mrb[59].mxu1 }
0x1965   :  { %v4016_v10 = vpop.eup %4015 }
0x1966   :  { %v3015_v11 = vpack.c.bf16 %v4016_v10, %v4016_v10 }
0x1968   :  { %3658 = vmatmul.mubr.bf16.vlgmr.msra.gmra.mrb[36].mxu0 %v3015_v11 }
0x1a3b   :  { %v3105_v12 = vpop.f32.mrb[36].mxu0 }
0x1a3c   :  { %v3106_v20 = vadd.f32 %v3362_v16, %v3105_v12  ;;  %v3659_v23 = vpop.f32.mrb[37].mxu0 }
0x1a3d   :  { %v3108_v24 = vpop.f32.mrb[38].mxu0 }
0x1a3e   :  { %3111 = vst [vmem:[%s4742_s12] sm:$0xff] %v3106_v20  ;;  %v3660_v42 = vpop.f32.mrb[39].mxu0 }
0x1a3f   :  { %3116 = vsyncpa [#allocation3], 1 }
0x1a40   :  { %3117 = vsyncpa [#allocation5], 1 }
0x1a41   :  { %3118 = vsyncpa [#allocation8], 1 }

</bundles_post_ra>
